<compile_context>
chip_gen: v5e
topology: v5e:2x2
jax: 0.10.0
libtpu: 0.0.40
codegen_flags: <defaults>
</compile_context>

<pallas_src>
import jax
import jax.numpy as jnp
import numpy as np
from jax import lax
from jax.experimental import pallas as pl
from jax.experimental.pallas import tpu as pltpu


# ----------------------------- Pallas kernel -------------------------------
def _make_lstm_fc_kernel(T, Bp, Hp):
    def kernel(x_ref, wih_ref, whh_ref, bg_ref, wfc_ref, bfc_ref,
               out_ref, gates_ref, hall_ref):
        """Single-invocation fused LSTM + FC.

        x_ref    : [T*Bp, Ep]    time-major, batch-padded inputs (feature + embeds)
        wih_ref  : [Ep, 4*Hp]    input->gates weights (gate-blocked, lane-aligned)
        whh_ref  : [Hp, 4*Hp]    hidden->gates weights (gate-blocked, lane-aligned)
        bg_ref   : [1, 4*Hp]     b_ih + b_hh (folded once into gates_in)
        wfc_ref  : [Hp, Vp]      final linear weight (transposed)
        bfc_ref  : [1, Vp]       final linear bias
        out_ref  : [T*Bp, Vp]    logits
        gates_ref: [T*Bp, 4*Hp]  scratch: hoisted input projection for all timesteps
        hall_ref : [T*Bp, Hp]    scratch: hidden states for all timesteps
        """
        # (1) Hoisted input projection for every timestep at once (off the serial chain).
        gates_ref[...] = (
            jnp.dot(x_ref[...], wih_ref[...], preferred_element_type=jnp.float32)
            + bg_ref[...])

        whh = whh_ref[...]

        # (2) Recurrence: only h @ W_hh^T is sequentially dependent.
        #     fori_loop with unroll=True -> t (hence `row`) is a compile-time constant
        #     per unrolled iteration; every slice below is statically (8,128)-aligned.
        def step(t, carry):
            h, c = carry
            row = t * Bp
            gates = gates_ref[pl.ds(row, Bp), :] + jnp.dot(
                h, whh, preferred_element_type=jnp.float32)          # [Bp, 4Hp]
            # PyTorch gate order: input, forget, cell(g), output.
            # Hp is a multiple of 128 -> each slice is vreg-lane-aligned.
            i_g = jax.nn.sigmoid(gates[:, 0 * Hp:1 * Hp])
            f_g = jax.nn.sigmoid(gates[:, 1 * Hp:2 * Hp])
            g_g = jnp.tanh(gates[:, 2 * Hp:3 * Hp])
            o_g = jax.nn.sigmoid(gates[:, 3 * Hp:4 * Hp])
            c_new = f_g * c + i_g * g_g
            h_new = o_g * jnp.tanh(c_new)
            hall_ref[pl.ds(row, Bp), :] = h_new
            return (h_new, c_new)

        init = (jnp.zeros((Bp, Hp), jnp.float32),
                jnp.zeros((Bp, Hp), jnp.float32))
        lax.fori_loop(0, T, step, init, unroll=True)

        # (3) Hoisted output projection for all timesteps at once (lane-dense store).
        out_ref[...] = (
            jnp.dot(hall_ref[...], wfc_ref[...], preferred_element_type=jnp.float32)
            + bfc_ref[...]).astype(out_ref.dtype)

    return kernel


def lstm_fc_pallas(x_flat, w_ih_t, w_hh_t, b_gates, w_fc_t, b_fc, *, T, Bp):
    """x_flat: [T*Bp, Ep] float32 (time-major, batch-padded) -> logits [T*Bp, Vp]."""
    TB, Ep = x_flat.shape
    Hp = w_hh_t.shape[0]
    Vp = w_fc_t.shape[1]
    assert TB == T * Bp

    kernel = _make_lstm_fc_kernel(T, Bp, Hp)
    return pl.pallas_call(
        kernel,
        out_shape=jax.ShapeDtypeStruct((TB, Vp), jnp.float32),
        in_specs=[pl.BlockSpec(memory_space=pltpu.MemorySpace.VMEM)
                  for _ in range(6)],
        out_specs=pl.BlockSpec(memory_space=pltpu.MemorySpace.VMEM),
        scratch_shapes=[
            pltpu.VMEM((TB, 4 * Hp), jnp.float32),   # gates_in (x @ W_ih^T + b), all t
            pltpu.VMEM((TB, Hp), jnp.float32),       # hidden states, all t
        ],
    )(x_flat, w_ih_t, w_hh_t, b_gates, w_fc_t, b_fc)


# --------------------------- padding helpers --------------------------------
def _round_up(n, m):
    return ((n + m - 1) // m) * m


def _pad_gate_axis(w, H, Hp, axis):
    """Place each of the 4 PyTorch-ordered (i, f, g, o) gate blocks of width H at a
    Hp-aligned offset along `axis`, zero-padding the remainder of each block."""
    gates = jnp.split(w, 4, axis=axis)
    pad = [(0, 0)] * w.ndim
    pad[axis] = (0, Hp - H)
    return jnp.concatenate([jnp.pad(g, pad) for g in gates], axis=axis)


# --------------------------- parameter creation -----------------------------
def init_params(key, embed_size, hidden_size, vocab_size):
    ks = jax.random.split(key, 7)
    s = 1.0 / np.sqrt(hidden_size)
    params = {
        # nn.Embedding(vocab_size, embed_size): weight ~ N(0, 1)
        "embedding": jax.random.normal(ks[0], (vocab_size, embed_size), jnp.float32),
        # nn.LSTM(embed_size, hidden_size): weights/biases ~ U(-1/sqrt(H), 1/sqrt(H))
        "w_ih": jax.random.uniform(ks[1], (4 * hidden_size, embed_size), jnp.float32, -s, s),
        "w_hh": jax.random.uniform(ks[2], (4 * hidden_size, hidden_size), jnp.float32, -s, s),
        "b_ih": jax.random.uniform(ks[3], (4 * hidden_size,), jnp.float32, -s, s),
        "b_hh": jax.random.uniform(ks[4], (4 * hidden_size,), jnp.float32, -s, s),
        # nn.Linear(hidden_size, vocab_size)
        "w_fc": jax.random.uniform(ks[5], (vocab_size, hidden_size), jnp.float32, -s, s),
        "b_fc": jax.random.uniform(ks[6], (vocab_size,), jnp.float32, -s, s),
    }
    return params


# ------------------------------ forward pass --------------------------------
@jax.jit
def encoder_decoder_forward(images, captions, params):
    """images (pre-extracted CLIP features): [B, E]; captions: [B, S] int32.
    Returns logits [B, S, V]  (T == S: caption truncated by one, feature prepended)."""
    # glue: embedding lookup + concat (gather has no clean tiled BlockSpec form)
    embeds = params["embedding"][captions[:, :-1]]                 # [B, S-1, E]
    x = jnp.concatenate([images[:, None, :], embeds], axis=1)      # [B, T,   E]
    B, T, E = x.shape
    H = params["w_hh"].shape[1]
    V = params["w_fc"].shape[0]

    # pad to (8, 128) hardware tiles
    Bp = _round_up(B, 8)
    Ep = _round_up(E, 128)
    Hp = _round_up(H, 128)
    Vp = _round_up(V, 128)

    # time-major, batch/embed padded, flattened to [T*Bp, Ep]
    x_tbe = jnp.transpose(x, (1, 0, 2)).astype(jnp.float32)        # [T, B, E]
    x_pad = jnp.zeros((T, Bp, Ep), jnp.float32).at[:, :B, :E].set(x_tbe)
    x_flat = x_pad.reshape(T * Bp, Ep)

    # gate-blocked, lane-aligned weights; both LSTM biases folded into one row vector
    w_ih_t = _pad_gate_axis(params["w_ih"].T, H, Hp, axis=1)                       # [E, 4Hp]
    w_ih_t = jnp.zeros((Ep, 4 * Hp), jnp.float32).at[:E].set(w_ih_t)               # [Ep, 4Hp]
    w_hh_t = _pad_gate_axis(params["w_hh"].T, H, Hp, axis=1)                       # [H, 4Hp]
    w_hh_t = jnp.zeros((Hp, 4 * Hp), jnp.float32).at[:H].set(w_hh_t)               # [Hp, 4Hp]
    b_g = _pad_gate_axis(params["b_ih"] + params["b_hh"], H, Hp, axis=0)[None, :]  # [1, 4Hp]
    w_fc_t = jnp.zeros((Hp, Vp), jnp.float32).at[:H, :V].set(params["w_fc"].T)     # [Hp, Vp]
    b_fc = jnp.zeros((1, Vp), jnp.float32).at[0, :V].set(params["b_fc"])           # [1, Vp]

    out_flat = lstm_fc_pallas(x_flat, w_ih_t, w_hh_t, b_g, w_fc_t, b_fc, T=T, Bp=Bp)
    out = out_flat.reshape(T, Bp, Vp)[:, :B, :V]                   # [T, B, V]
    return jnp.transpose(out, (1, 0, 2))                           # [B, T, V]


# ------------------------------ JAX reference --------------------------------
def reference_forward(images, captions, params):
    embeds = params["embedding"][captions[:, :-1]]
    x = jnp.concatenate([images[:, None, :], embeds], axis=1)      # [B, T, E]
    B, T, E = x.shape
    H = params["w_hh"].shape[1]

    w_ih_t, w_hh_t = params["w_ih"].T, params["w_hh"].T
    b = params["b_ih"] + params["b_hh"]

    def step(carry, x_t):
        h, c = carry
        gates = x_t @ w_ih_t + h @ w_hh_t + b
        i = jax.nn.sigmoid(gates[:, 0 * H:1 * H])
        f = jax.nn.sigmoid(gates[:, 1 * H:2 * H])
        g = jnp.tanh(gates[:, 2 * H:3 * H])
        o = jax.nn.sigmoid(gates[:, 3 * H:4 * H])
        c = f * c + i * g
        h = o * jnp.tanh(c)
        return (h, c), h

    h0 = jnp.zeros((B, H), jnp.float32)
    (_, _), hs = lax.scan(step, (h0, h0), jnp.transpose(x, (1, 0, 2)))
    hs = jnp.transpose(hs, (1, 0, 2))                              # [B, T, H]
    return hs @ params["w_fc"].T + params["b_fc"]


# ---------------------------------- main -------------------------------------
if __name__ == "__main__":
    B = 2           # batch
    S = 8           # caption length (T == S after truncate + prepend feature)
    E = 32          # embed_size (== feature dim of images)
    H = 32          # hidden_size
    V = 64          # vocab_size

    key = jax.random.PRNGKey(0)
    k_img, k_cap, k_par = jax.random.split(key, 3)

    images = jax.random.normal(k_img, (B, E), jnp.float32)          # CLIP features
    captions = jax.random.randint(k_cap, (B, S), 0, V, jnp.int32)
    params = init_params(k_par, E, H, V)

    out = jax.block_until_ready(encoder_decoder_forward(images, captions, params))
    ref = jax.block_until_ready(reference_forward(images, captions, params))

    assert out.shape == (B, S, V)
    np.testing.assert_allclose(np.asarray(out), np.asarray(ref), rtol=1e-4, atol=1e-4)

    print("KERNEL_OK")
</pallas_src>

<mosaic_0001>
module attributes {stable_mosaic.version = 11 : i64} {
  func.func @kernel(%arg0: memref<64x128xf32, #tpu.memory_space<vmem>>, %arg1: memref<128x512xf32, #tpu.memory_space<vmem>>, %arg2: memref<128x512xf32, #tpu.memory_space<vmem>>, %arg3: memref<1x512xf32, #tpu.memory_space<vmem>>, %arg4: memref<128x128xf32, #tpu.memory_space<vmem>>, %arg5: memref<1x128xf32, #tpu.memory_space<vmem>>, %arg6: memref<64x128xf32, #tpu.memory_space<vmem>>, %arg7: memref<64x512xf32, #tpu.memory_space<vmem>>, %arg8: memref<64x128xf32, #tpu.memory_space<vmem>>) attributes {dimension_semantics = [], scalar_prefetch = 0 : i64, scratch_operands = 2 : i64, tpu.core_type = #tpu.core_type<tc>} {
    %c0 = arith.constant 0 : index
    %c0_0 = arith.constant 0 : index
    %0 = vector.load %arg0[%c0, %c0_0] : memref<64x128xf32, #tpu.memory_space<vmem>>, vector<64x128xf32>
    %c0_1 = arith.constant 0 : index
    %c0_2 = arith.constant 0 : index
    %1 = vector.load %arg1[%c0_1, %c0_2] : memref<128x512xf32, #tpu.memory_space<vmem>>, vector<128x512xf32>
    %cst = arith.constant dense<0.000000e+00> : vector<64x512xf32>
    %2 = tpu.matmul %0, %1, %cst {dimension_numbers = #tpu.dot_dimension_numbers<[1], [0], [0], [1], [0, 0, 1, 1], [], []>} : vector<64x128xf32>, vector<128x512xf32>, vector<64x512xf32> -> vector<64x512xf32>
    %c0_3 = arith.constant 0 : index
    %c0_4 = arith.constant 0 : index
    %3 = vector.load %arg3[%c0_3, %c0_4] : memref<1x512xf32, #tpu.memory_space<vmem>>, vector<1x512xf32>
    %4 = vector.broadcast %3 : vector<1x512xf32> to vector<64x512xf32>
    %5 = arith.addf %2, %4 : vector<64x512xf32>
    %c0_5 = arith.constant 0 : index
    %c0_6 = arith.constant 0 : index
    %6 = vector.load %arg7[%c0_5, %c0_6] : memref<64x512xf32, #tpu.memory_space<vmem>>, vector<64x512xf32>
    tpu.vector_store %arg7[%c0_5, %c0_6], %5 {strides = array<i32>} : memref<64x512xf32, #tpu.memory_space<vmem>>, vector<64x512xf32>,
    %c0_7 = arith.constant 0 : index
    %c0_8 = arith.constant 0 : index
    %7 = vector.load %arg2[%c0_7, %c0_8] : memref<128x512xf32, #tpu.memory_space<vmem>>, vector<128x512xf32>
    %cst_9 = arith.constant 0.000000e+00 : f32
    %8 = vector.broadcast %cst_9 : f32 to vector<8x128xf32>
    %cst_10 = arith.constant 0.000000e+00 : f32
    %9 = vector.broadcast %cst_10 : f32 to vector<8x128xf32>
    %c0_i32 = arith.constant 0 : i32
    %c8_i32 = arith.constant 8 : i32
    %10 = arith.muli %c0_i32, %c8_i32 : i32
    %11 = arith.index_cast %10 : i32 to index
    %c0_11 = arith.constant 0 : index
    %12 = vector.load %arg7[%11, %c0_11] : memref<64x512xf32, #tpu.memory_space<vmem>>, vector<8x512xf32>
    %cst_12 = arith.constant dense<0.000000e+00> : vector<8x512xf32>
    %13 = tpu.matmul %8, %7, %cst_12 {dimension_numbers = #tpu.dot_dimension_numbers<[1], [0], [0], [1], [0, 0, 1, 1], [], []>} : vector<8x128xf32>, vector<128x512xf32>, vector<8x512xf32> -> vector<8x512xf32>
    %14 = arith.addf %12, %13 : vector<8x512xf32>
    %15 = vector.extract_strided_slice %14 {offsets = [0, 0], sizes = [8, 128], strides = [1, 1]} : vector<8x512xf32> to vector<8x128xf32>
    %16 = arith.negf %15 : vector<8x128xf32>
    %17 = math.exp %16 : vector<8x128xf32>
    %cst_13 = arith.constant 1.000000e+00 : f32
    %18 = vector.broadcast %cst_13 : f32 to vector<8x128xf32>
    %19 = arith.addf %18, %17 : vector<8x128xf32>
    %20 = arith.divf %18, %19 : vector<8x128xf32>
    %21 = vector.extract_strided_slice %14 {offsets = [0, 128], sizes = [8, 128], strides = [1, 1]} : vector<8x512xf32> to vector<8x128xf32>
    %22 = arith.negf %21 : vector<8x128xf32>
    %23 = math.exp %22 : vector<8x128xf32>
    %cst_14 = arith.constant 1.000000e+00 : f32
    %24 = vector.broadcast %cst_14 : f32 to vector<8x128xf32>
    %25 = arith.addf %24, %23 : vector<8x128xf32>
    %26 = arith.divf %24, %25 : vector<8x128xf32>
    %27 = vector.extract_strided_slice %14 {offsets = [0, 256], sizes = [8, 128], strides = [1, 1]} : vector<8x512xf32> to vector<8x128xf32>
    %28 = math.tanh %27 : vector<8x128xf32>
    %29 = vector.extract_strided_slice %14 {offsets = [0, 384], sizes = [8, 128], strides = [1, 1]} : vector<8x512xf32> to vector<8x128xf32>
    %30 = arith.negf %29 : vector<8x128xf32>
    %31 = math.exp %30 : vector<8x128xf32>
    %cst_15 = arith.constant 1.000000e+00 : f32
    %32 = vector.broadcast %cst_15 : f32 to vector<8x128xf32>
    %33 = arith.addf %32, %31 : vector<8x128xf32>
    %34 = arith.divf %32, %33 : vector<8x128xf32>
    %35 = arith.mulf %26, %9 : vector<8x128xf32>
    %36 = arith.mulf %20, %28 : vector<8x128xf32>
    %37 = arith.addf %35, %36 : vector<8x128xf32>
    %38 = math.tanh %37 : vector<8x128xf32>
    %39 = arith.mulf %34, %38 : vector<8x128xf32>
    %40 = arith.index_cast %10 : i32 to index
    %c0_16 = arith.constant 0 : index
    %41 = vector.load %arg8[%40, %c0_16] : memref<64x128xf32, #tpu.memory_space<vmem>>, vector<8x128xf32>
    tpu.vector_store %arg8[%40, %c0_16], %39 {strides = array<i32>} : memref<64x128xf32, #tpu.memory_space<vmem>>, vector<8x128xf32>,
    %c1_i32 = arith.constant 1 : i32
    %c8_i32_17 = arith.constant 8 : i32
    %42 = arith.muli %c1_i32, %c8_i32_17 : i32
    %43 = arith.index_cast %42 : i32 to index
    %c0_18 = arith.constant 0 : index
    %44 = vector.load %arg7[%43, %c0_18] : memref<64x512xf32, #tpu.memory_space<vmem>>, vector<8x512xf32>
    %cst_19 = arith.constant dense<0.000000e+00> : vector<8x512xf32>
    %45 = tpu.matmul %39, %7, %cst_19 {dimension_numbers = #tpu.dot_dimension_numbers<[1], [0], [0], [1], [0, 0, 1, 1], [], []>} : vector<8x128xf32>, vector<128x512xf32>, vector<8x512xf32> -> vector<8x512xf32>
    %46 = arith.addf %44, %45 : vector<8x512xf32>
    %47 = vector.extract_strided_slice %46 {offsets = [0, 0], sizes = [8, 128], strides = [1, 1]} : vector<8x512xf32> to vector<8x128xf32>
    %48 = arith.negf %47 : vector<8x128xf32>
    %49 = math.exp %48 : vector<8x128xf32>
    %cst_20 = arith.constant 1.000000e+00 : f32
    %50 = vector.broadcast %cst_20 : f32 to vector<8x128xf32>
    %51 = arith.addf %50, %49 : vector<8x128xf32>
    %52 = arith.divf %50, %51 : vector<8x128xf32>
    %53 = vector.extract_strided_slice %46 {offsets = [0, 128], sizes = [8, 128], strides = [1, 1]} : vector<8x512xf32> to vector<8x128xf32>
    %54 = arith.negf %53 : vector<8x128xf32>
    %55 = math.exp %54 : vector<8x128xf32>
    %cst_21 = arith.constant 1.000000e+00 : f32
    %56 = vector.broadcast %cst_21 : f32 to vector<8x128xf32>
    %57 = arith.addf %56, %55 : vector<8x128xf32>
    %58 = arith.divf %56, %57 : vector<8x128xf32>
    %59 = vector.extract_strided_slice %46 {offsets = [0, 256], sizes = [8, 128], strides = [1, 1]} : vector<8x512xf32> to vector<8x128xf32>
    %60 = math.tanh %59 : vector<8x128xf32>
    %61 = vector.extract_strided_slice %46 {offsets = [0, 384], sizes = [8, 128], strides = [1, 1]} : vector<8x512xf32> to vector<8x128xf32>
    %62 = arith.negf %61 : vector<8x128xf32>
    %63 = math.exp %62 : vector<8x128xf32>
    %cst_22 = arith.constant 1.000000e+00 : f32
    %64 = vector.broadcast %cst_22 : f32 to vector<8x128xf32>
    %65 = arith.addf %64, %63 : vector<8x128xf32>
    %66 = arith.divf %64, %65 : vector<8x128xf32>
    %67 = arith.mulf %58, %37 : vector<8x128xf32>
    %68 = arith.mulf %52, %60 : vector<8x128xf32>
    %69 = arith.addf %67, %68 : vector<8x128xf32>
    %70 = math.tanh %69 : vector<8x128xf32>
    %71 = arith.mulf %66, %70 : vector<8x128xf32>
    %72 = arith.index_cast %42 : i32 to index
    %c0_23 = arith.constant 0 : index
    %73 = vector.load %arg8[%72, %c0_23] : memref<64x128xf32, #tpu.memory_space<vmem>>, vector<8x128xf32>
    tpu.vector_store %arg8[%72, %c0_23], %71 {strides = array<i32>} : memref<64x128xf32, #tpu.memory_space<vmem>>, vector<8x128xf32>,
    %c2_i32 = arith.constant 2 : i32
    %c8_i32_24 = arith.constant 8 : i32
    %74 = arith.muli %c2_i32, %c8_i32_24 : i32
    %75 = arith.index_cast %74 : i32 to index
    %c0_25 = arith.constant 0 : index
    %76 = vector.load %arg7[%75, %c0_25] : memref<64x512xf32, #tpu.memory_space<vmem>>, vector<8x512xf32>
    %cst_26 = arith.constant dense<0.000000e+00> : vector<8x512xf32>
    %77 = tpu.matmul %71, %7, %cst_26 {dimension_numbers = #tpu.dot_dimension_numbers<[1], [0], [0], [1], [0, 0, 1, 1], [], []>} : vector<8x128xf32>, vector<128x512xf32>, vector<8x512xf32> -> vector<8x512xf32>
    %78 = arith.addf %76, %77 : vector<8x512xf32>
    %79 = vector.extract_strided_slice %78 {offsets = [0, 0], sizes = [8, 128], strides = [1, 1]} : vector<8x512xf32> to vector<8x128xf32>
    %80 = arith.negf %79 : vector<8x128xf32>
    %81 = math.exp %80 : vector<8x128xf32>
    %cst_27 = arith.constant 1.000000e+00 : f32
    %82 = vector.broadcast %cst_27 : f32 to vector<8x128xf32>
    %83 = arith.addf %82, %81 : vector<8x128xf32>
    %84 = arith.divf %82, %83 : vector<8x128xf32>
    %85 = vector.extract_strided_slice %78 {offsets = [0, 128], sizes = [8, 128], strides = [1, 1]} : vector<8x512xf32> to vector<8x128xf32>
    %86 = arith.negf %85 : vector<8x128xf32>
    %87 = math.exp %86 : vector<8x128xf32>
    %cst_28 = arith.constant 1.000000e+00 : f32
    %88 = vector.broadcast %cst_28 : f32 to vector<8x128xf32>
    %89 = arith.addf %88, %87 : vector<8x128xf32>
    %90 = arith.divf %88, %89 : vector<8x128xf32>
    %91 = vector.extract_strided_slice %78 {offsets = [0, 256], sizes = [8, 128], strides = [1, 1]} : vector<8x512xf32> to vector<8x128xf32>
    %92 = math.tanh %91 : vector<8x128xf32>
    %93 = vector.extract_strided_slice %78 {offsets = [0, 384], sizes = [8, 128], strides = [1, 1]} : vector<8x512xf32> to vector<8x128xf32>
    %94 = arith.negf %93 : vector<8x128xf32>
    %95 = math.exp %94 : vector<8x128xf32>
    %cst_29 = arith.constant 1.000000e+00 : f32
    %96 = vector.broadcast %cst_29 : f32 to vector<8x128xf32>
    %97 = arith.addf %96, %95 : vector<8x128xf32>
    %98 = arith.divf %96, %97 : vector<8x128xf32>
    %99 = arith.mulf %90, %69 : vector<8x128xf32>
    %100 = arith.mulf %84, %92 : vector<8x128xf32>
    %101 = arith.addf %99, %100 : vector<8x128xf32>
    %102 = math.tanh %101 : vector<8x128xf32>
    %103 = arith.mulf %98, %102 : vector<8x128xf32>
    %104 = arith.index_cast %74 : i32 to index
    %c0_30 = arith.constant 0 : index
    %105 = vector.load %arg8[%104, %c0_30] : memref<64x128xf32, #tpu.memory_space<vmem>>, vector<8x128xf32>
    tpu.vector_store %arg8[%104, %c0_30], %103 {strides = array<i32>} : memref<64x128xf32, #tpu.memory_space<vmem>>, vector<8x128xf32>,
    %c3_i32 = arith.constant 3 : i32
    %c8_i32_31 = arith.constant 8 : i32
    %106 = arith.muli %c3_i32, %c8_i32_31 : i32
    %107 = arith.index_cast %106 : i32 to index
    %c0_32 = arith.constant 0 : index
    %108 = vector.load %arg7[%107, %c0_32] : memref<64x512xf32, #tpu.memory_space<vmem>>, vector<8x512xf32>
    %cst_33 = arith.constant dense<0.000000e+00> : vector<8x512xf32>
    %109 = tpu.matmul %103, %7, %cst_33 {dimension_numbers = #tpu.dot_dimension_numbers<[1], [0], [0], [1], [0, 0, 1, 1], [], []>} : vector<8x128xf32>, vector<128x512xf32>, vector<8x512xf32> -> vector<8x512xf32>
    %110 = arith.addf %108, %109 : vector<8x512xf32>
    %111 = vector.extract_strided_slice %110 {offsets = [0, 0], sizes = [8, 128], strides = [1, 1]} : vector<8x512xf32> to vector<8x128xf32>
    %112 = arith.negf %111 : vector<8x128xf32>
    %113 = math.exp %112 : vector<8x128xf32>
    %cst_34 = arith.constant 1.000000e+00 : f32
    %114 = vector.broadcast %cst_34 : f32 to vector<8x128xf32>
    %115 = arith.addf %114, %113 : vector<8x128xf32>
    %116 = arith.divf %114, %115 : vector<8x128xf32>
    %117 = vector.extract_strided_slice %110 {offsets = [0, 128], sizes = [8, 128], strides = [1, 1]} : vector<8x512xf32> to vector<8x128xf32>
    %118 = arith.negf %117 : vector<8x128xf32>
    %119 = math.exp %118 : vector<8x128xf32>
    %cst_35 = arith.constant 1.000000e+00 : f32
    %120 = vector.broadcast %cst_35 : f32 to vector<8x128xf32>
    %121 = arith.addf %120, %119 : vector<8x128xf32>
    %122 = arith.divf %120, %121 : vector<8x128xf32>
    %123 = vector.extract_strided_slice %110 {offsets = [0, 256], sizes = [8, 128], strides = [1, 1]} : vector<8x512xf32> to vector<8x128xf32>
    %124 = math.tanh %123 : vector<8x128xf32>
    %125 = vector.extract_strided_slice %110 {offsets = [0, 384], sizes = [8, 128], strides = [1, 1]} : vector<8x512xf32> to vector<8x128xf32>
    %126 = arith.negf %125 : vector<8x128xf32>
    %127 = math.exp %126 : vector<8x128xf32>
    %cst_36 = arith.constant 1.000000e+00 : f32
    %128 = vector.broadcast %cst_36 : f32 to vector<8x128xf32>
    %129 = arith.addf %128, %127 : vector<8x128xf32>
    %130 = arith.divf %128, %129 : vector<8x128xf32>
    %131 = arith.mulf %122, %101 : vector<8x128xf32>
    %132 = arith.mulf %116, %124 : vector<8x128xf32>
    %133 = arith.addf %131, %132 : vector<8x128xf32>
    %134 = math.tanh %133 : vector<8x128xf32>
    %135 = arith.mulf %130, %134 : vector<8x128xf32>
    %136 = arith.index_cast %106 : i32 to index
    %c0_37 = arith.constant 0 : index
    %137 = vector.load %arg8[%136, %c0_37] : memref<64x128xf32, #tpu.memory_space<vmem>>, vector<8x128xf32>
    tpu.vector_store %arg8[%136, %c0_37], %135 {strides = array<i32>} : memref<64x128xf32, #tpu.memory_space<vmem>>, vector<8x128xf32>,
    %c4_i32 = arith.constant 4 : i32
    %c8_i32_38 = arith.constant 8 : i32
    %138 = arith.muli %c4_i32, %c8_i32_38 : i32
    %139 = arith.index_cast %138 : i32 to index
    %c0_39 = arith.constant 0 : index
    %140 = vector.load %arg7[%139, %c0_39] : memref<64x512xf32, #tpu.memory_space<vmem>>, vector<8x512xf32>
    %cst_40 = arith.constant dense<0.000000e+00> : vector<8x512xf32>
    %141 = tpu.matmul %135, %7, %cst_40 {dimension_numbers = #tpu.dot_dimension_numbers<[1], [0], [0], [1], [0, 0, 1, 1], [], []>} : vector<8x128xf32>, vector<128x512xf32>, vector<8x512xf32> -> vector<8x512xf32>
    %142 = arith.addf %140, %141 : vector<8x512xf32>
    %143 = vector.extract_strided_slice %142 {offsets = [0, 0], sizes = [8, 128], strides = [1, 1]} : vector<8x512xf32> to vector<8x128xf32>
    %144 = arith.negf %143 : vector<8x128xf32>
    %145 = math.exp %144 : vector<8x128xf32>
    %cst_41 = arith.constant 1.000000e+00 : f32
    %146 = vector.broadcast %cst_41 : f32 to vector<8x128xf32>
    %147 = arith.addf %146, %145 : vector<8x128xf32>
    %148 = arith.divf %146, %147 : vector<8x128xf32>
    %149 = vector.extract_strided_slice %142 {offsets = [0, 128], sizes = [8, 128], strides = [1, 1]} : vector<8x512xf32> to vector<8x128xf32>
    %150 = arith.negf %149 : vector<8x128xf32>
    %151 = math.exp %150 : vector<8x128xf32>
    %cst_42 = arith.constant 1.000000e+00 : f32
    %152 = vector.broadcast %cst_42 : f32 to vector<8x128xf32>
    %153 = arith.addf %152, %151 : vector<8x128xf32>
    %154 = arith.divf %152, %153 : vector<8x128xf32>
    %155 = vector.extract_strided_slice %142 {offsets = [0, 256], sizes = [8, 128], strides = [1, 1]} : vector<8x512xf32> to vector<8x128xf32>
    %156 = math.tanh %155 : vector<8x128xf32>
    %157 = vector.extract_strided_slice %142 {offsets = [0, 384], sizes = [8, 128], strides = [1, 1]} : vector<8x512xf32> to vector<8x128xf32>
    %158 = arith.negf %157 : vector<8x128xf32>
    %159 = math.exp %158 : vector<8x128xf32>
    %cst_43 = arith.constant 1.000000e+00 : f32
    %160 = vector.broadcast %cst_43 : f32 to vector<8x128xf32>
    %161 = arith.addf %160, %159 : vector<8x128xf32>
    %162 = arith.divf %160, %161 : vector<8x128xf32>
    %163 = arith.mulf %154, %133 : vector<8x128xf32>
    %164 = arith.mulf %148, %156 : vector<8x128xf32>
    %165 = arith.addf %163, %164 : vector<8x128xf32>
    %166 = math.tanh %165 : vector<8x128xf32>
    %167 = arith.mulf %162, %166 : vector<8x128xf32>
    %168 = arith.index_cast %138 : i32 to index
    %c0_44 = arith.constant 0 : index
    %169 = vector.load %arg8[%168, %c0_44] : memref<64x128xf32, #tpu.memory_space<vmem>>, vector<8x128xf32>
    tpu.vector_store %arg8[%168, %c0_44], %167 {strides = array<i32>} : memref<64x128xf32, #tpu.memory_space<vmem>>, vector<8x128xf32>,
    %c5_i32 = arith.constant 5 : i32
    %c8_i32_45 = arith.constant 8 : i32
    %170 = arith.muli %c5_i32, %c8_i32_45 : i32
    %171 = arith.index_cast %170 : i32 to index
    %c0_46 = arith.constant 0 : index
    %172 = vector.load %arg7[%171, %c0_46] : memref<64x512xf32, #tpu.memory_space<vmem>>, vector<8x512xf32>
    %cst_47 = arith.constant dense<0.000000e+00> : vector<8x512xf32>
    %173 = tpu.matmul %167, %7, %cst_47 {dimension_numbers = #tpu.dot_dimension_numbers<[1], [0], [0], [1], [0, 0, 1, 1], [], []>} : vector<8x128xf32>, vector<128x512xf32>, vector<8x512xf32> -> vector<8x512xf32>
    %174 = arith.addf %172, %173 : vector<8x512xf32>
    %175 = vector.extract_strided_slice %174 {offsets = [0, 0], sizes = [8, 128], strides = [1, 1]} : vector<8x512xf32> to vector<8x128xf32>
    %176 = arith.negf %175 : vector<8x128xf32>
    %177 = math.exp %176 : vector<8x128xf32>
    %cst_48 = arith.constant 1.000000e+00 : f32
    %178 = vector.broadcast %cst_48 : f32 to vector<8x128xf32>
    %179 = arith.addf %178, %177 : vector<8x128xf32>
    %180 = arith.divf %178, %179 : vector<8x128xf32>
    %181 = vector.extract_strided_slice %174 {offsets = [0, 128], sizes = [8, 128], strides = [1, 1]} : vector<8x512xf32> to vector<8x128xf32>
    %182 = arith.negf %181 : vector<8x128xf32>
    %183 = math.exp %182 : vector<8x128xf32>
    %cst_49 = arith.constant 1.000000e+00 : f32
    %184 = vector.broadcast %cst_49 : f32 to vector<8x128xf32>
    %185 = arith.addf %184, %183 : vector<8x128xf32>
    %186 = arith.divf %184, %185 : vector<8x128xf32>
    %187 = vector.extract_strided_slice %174 {offsets = [0, 256], sizes = [8, 128], strides = [1, 1]} : vector<8x512xf32> to vector<8x128xf32>
    %188 = math.tanh %187 : vector<8x128xf32>
    %189 = vector.extract_strided_slice %174 {offsets = [0, 384], sizes = [8, 128], strides = [1, 1]} : vector<8x512xf32> to vector<8x128xf32>
    %190 = arith.negf %189 : vector<8x128xf32>
    %191 = math.exp %190 : vector<8x128xf32>
    %cst_50 = arith.constant 1.000000e+00 : f32
    %192 = vector.broadcast %cst_50 : f32 to vector<8x128xf32>
    %193 = arith.addf %192, %191 : vector<8x128xf32>
    %194 = arith.divf %192, %193 : vector<8x128xf32>
    %195 = arith.mulf %186, %165 : vector<8x128xf32>
    %196 = arith.mulf %180, %188 : vector<8x128xf32>
    %197 = arith.addf %195, %196 : vector<8x128xf32>
    %198 = math.tanh %197 : vector<8x128xf32>
    %199 = arith.mulf %194, %198 : vector<8x128xf32>
    %200 = arith.index_cast %170 : i32 to index
    %c0_51 = arith.constant 0 : index
    %201 = vector.load %arg8[%200, %c0_51] : memref<64x128xf32, #tpu.memory_space<vmem>>, vector<8x128xf32>
    tpu.vector_store %arg8[%200, %c0_51], %199 {strides = array<i32>} : memref<64x128xf32, #tpu.memory_space<vmem>>, vector<8x128xf32>,
    %c6_i32 = arith.constant 6 : i32
    %c8_i32_52 = arith.constant 8 : i32
    %202 = arith.muli %c6_i32, %c8_i32_52 : i32
    %203 = arith.index_cast %202 : i32 to index
    %c0_53 = arith.constant 0 : index
    %204 = vector.load %arg7[%203, %c0_53] : memref<64x512xf32, #tpu.memory_space<vmem>>, vector<8x512xf32>
    %cst_54 = arith.constant dense<0.000000e+00> : vector<8x512xf32>
    %205 = tpu.matmul %199, %7, %cst_54 {dimension_numbers = #tpu.dot_dimension_numbers<[1], [0], [0], [1], [0, 0, 1, 1], [], []>} : vector<8x128xf32>, vector<128x512xf32>, vector<8x512xf32> -> vector<8x512xf32>
    %206 = arith.addf %204, %205 : vector<8x512xf32>
    %207 = vector.extract_strided_slice %206 {offsets = [0, 0], sizes = [8, 128], strides = [1, 1]} : vector<8x512xf32> to vector<8x128xf32>
    %208 = arith.negf %207 : vector<8x128xf32>
    %209 = math.exp %208 : vector<8x128xf32>
    %cst_55 = arith.constant 1.000000e+00 : f32
    %210 = vector.broadcast %cst_55 : f32 to vector<8x128xf32>
    %211 = arith.addf %210, %209 : vector<8x128xf32>
    %212 = arith.divf %210, %211 : vector<8x128xf32>
    %213 = vector.extract_strided_slice %206 {offsets = [0, 128], sizes = [8, 128], strides = [1, 1]} : vector<8x512xf32> to vector<8x128xf32>
    %214 = arith.negf %213 : vector<8x128xf32>
    %215 = math.exp %214 : vector<8x128xf32>
    %cst_56 = arith.constant 1.000000e+00 : f32
    %216 = vector.broadcast %cst_56 : f32 to vector<8x128xf32>
    %217 = arith.addf %216, %215 : vector<8x128xf32>
    %218 = arith.divf %216, %217 : vector<8x128xf32>
    %219 = vector.extract_strided_slice %206 {offsets = [0, 256], sizes = [8, 128], strides = [1, 1]} : vector<8x512xf32> to vector<8x128xf32>
    %220 = math.tanh %219 : vector<8x128xf32>
    %221 = vector.extract_strided_slice %206 {offsets = [0, 384], sizes = [8, 128], strides = [1, 1]} : vector<8x512xf32> to vector<8x128xf32>
    %222 = arith.negf %221 : vector<8x128xf32>
    %223 = math.exp %222 : vector<8x128xf32>
    %cst_57 = arith.constant 1.000000e+00 : f32
    %224 = vector.broadcast %cst_57 : f32 to vector<8x128xf32>
    %225 = arith.addf %224, %223 : vector<8x128xf32>
    %226 = arith.divf %224, %225 : vector<8x128xf32>
    %227 = arith.mulf %218, %197 : vector<8x128xf32>
    %228 = arith.mulf %212, %220 : vector<8x128xf32>
    %229 = arith.addf %227, %228 : vector<8x128xf32>
    %230 = math.tanh %229 : vector<8x128xf32>
    %231 = arith.mulf %226, %230 : vector<8x128xf32>
    %232 = arith.index_cast %202 : i32 to index
    %c0_58 = arith.constant 0 : index
    %233 = vector.load %arg8[%232, %c0_58] : memref<64x128xf32, #tpu.memory_space<vmem>>, vector<8x128xf32>
    tpu.vector_store %arg8[%232, %c0_58], %231 {strides = array<i32>} : memref<64x128xf32, #tpu.memory_space<vmem>>, vector<8x128xf32>,
    %c7_i32 = arith.constant 7 : i32
    %c8_i32_59 = arith.constant 8 : i32
    %234 = arith.muli %c7_i32, %c8_i32_59 : i32
    %235 = arith.index_cast %234 : i32 to index
    %c0_60 = arith.constant 0 : index
    %236 = vector.load %arg7[%235, %c0_60] : memref<64x512xf32, #tpu.memory_space<vmem>>, vector<8x512xf32>
    %cst_61 = arith.constant dense<0.000000e+00> : vector<8x512xf32>
    %237 = tpu.matmul %231, %7, %cst_61 {dimension_numbers = #tpu.dot_dimension_numbers<[1], [0], [0], [1], [0, 0, 1, 1], [], []>} : vector<8x128xf32>, vector<128x512xf32>, vector<8x512xf32> -> vector<8x512xf32>
    %238 = arith.addf %236, %237 : vector<8x512xf32>
    %239 = vector.extract_strided_slice %238 {offsets = [0, 0], sizes = [8, 128], strides = [1, 1]} : vector<8x512xf32> to vector<8x128xf32>
    %240 = arith.negf %239 : vector<8x128xf32>
    %241 = math.exp %240 : vector<8x128xf32>
    %cst_62 = arith.constant 1.000000e+00 : f32
    %242 = vector.broadcast %cst_62 : f32 to vector<8x128xf32>
    %243 = arith.addf %242, %241 : vector<8x128xf32>
    %244 = arith.divf %242, %243 : vector<8x128xf32>
    %245 = vector.extract_strided_slice %238 {offsets = [0, 128], sizes = [8, 128], strides = [1, 1]} : vector<8x512xf32> to vector<8x128xf32>
    %246 = arith.negf %245 : vector<8x128xf32>
    %247 = math.exp %246 : vector<8x128xf32>
    %cst_63 = arith.constant 1.000000e+00 : f32
    %248 = vector.broadcast %cst_63 : f32 to vector<8x128xf32>
    %249 = arith.addf %248, %247 : vector<8x128xf32>
    %250 = arith.divf %248, %249 : vector<8x128xf32>
    %251 = vector.extract_strided_slice %238 {offsets = [0, 256], sizes = [8, 128], strides = [1, 1]} : vector<8x512xf32> to vector<8x128xf32>
    %252 = math.tanh %251 : vector<8x128xf32>
    %253 = vector.extract_strided_slice %238 {offsets = [0, 384], sizes = [8, 128], strides = [1, 1]} : vector<8x512xf32> to vector<8x128xf32>
    %254 = arith.negf %253 : vector<8x128xf32>
    %255 = math.exp %254 : vector<8x128xf32>
    %cst_64 = arith.constant 1.000000e+00 : f32
    %256 = vector.broadcast %cst_64 : f32 to vector<8x128xf32>
    %257 = arith.addf %256, %255 : vector<8x128xf32>
    %258 = arith.divf %256, %257 : vector<8x128xf32>
    %259 = arith.mulf %250, %229 : vector<8x128xf32>
    %260 = arith.mulf %244, %252 : vector<8x128xf32>
    %261 = arith.addf %259, %260 : vector<8x128xf32>
    %262 = math.tanh %261 : vector<8x128xf32>
    %263 = arith.mulf %258, %262 : vector<8x128xf32>
    %264 = arith.index_cast %234 : i32 to index
    %c0_65 = arith.constant 0 : index
    %265 = vector.load %arg8[%264, %c0_65] : memref<64x128xf32, #tpu.memory_space<vmem>>, vector<8x128xf32>
    tpu.vector_store %arg8[%264, %c0_65], %263 {strides = array<i32>} : memref<64x128xf32, #tpu.memory_space<vmem>>, vector<8x128xf32>,
    %c8_i32_66 = arith.constant 8 : i32
    %c0_67 = arith.constant 0 : index
    %c0_68 = arith.constant 0 : index
    %266 = vector.load %arg8[%c0_67, %c0_68] : memref<64x128xf32, #tpu.memory_space<vmem>>, vector<64x128xf32>
    %c0_69 = arith.constant 0 : index
    %c0_70 = arith.constant 0 : index
    %267 = vector.load %arg4[%c0_69, %c0_70] : memref<128x128xf32, #tpu.memory_space<vmem>>, vector<128x128xf32>
    %cst_71 = arith.constant dense<0.000000e+00> : vector<64x128xf32>
    %268 = tpu.matmul %266, %267, %cst_71 {dimension_numbers = #tpu.dot_dimension_numbers<[1], [0], [0], [1], [0, 0, 1, 1], [], []>} : vector<64x128xf32>, vector<128x128xf32>, vector<64x128xf32> -> vector<64x128xf32>
    %c0_72 = arith.constant 0 : index
    %c0_73 = arith.constant 0 : index
    %269 = vector.load %arg5[%c0_72, %c0_73] : memref<1x128xf32, #tpu.memory_space<vmem>>, vector<1x128xf32>
    %270 = vector.broadcast %269 : vector<1x128xf32> to vector<64x128xf32>
    %271 = arith.addf %268, %270 : vector<64x128xf32>
    %c0_74 = arith.constant 0 : index
    %c0_75 = arith.constant 0 : index
    %272 = vector.load %arg6[%c0_74, %c0_75] : memref<64x128xf32, #tpu.memory_space<vmem>>, vector<64x128xf32>
    tpu.vector_store %arg6[%c0_74, %c0_75], %271 {strides = array<i32>} : memref<64x128xf32, #tpu.memory_space<vmem>>, vector<64x128xf32>,
    return
  }
}

</mosaic_0001>

<bundles_post_ra>
// kernel: encoder_decoder_forward.1
= control target key start
LH: loop header
LB: loop body
LE: loop exit
PB: predicated region body
PF: predicated region fallthrough
CT: control target
= control target key end

     0   :  { %v3652_v57 = vmov 0.0   ;;  %s3645_s1 = inlined_call_operand.vmem [shape: f32[128,512], index: 1, kind: input, shape index: {}]   ;;  %s3646_s2 = inlined_call_operand.vmem [shape: f32[128,512], index: 2, kind: input, shape index: {}]   ;;  %s3647_s0 = inlined_call_operand.vmem [shape: f32[64,128], index: 0, kind: input, shape index: {}]   ;;  %s3648_s3 = inlined_call_operand.vmem [shape: f32[1,512], index: 3, kind: input, shape index: {}]   ;;  %s3649_s4 = inlined_call_operand.vmem [shape: f32[128,128], index: 4, kind: input, shape index: {}]   ;;  %s3650_s5 = inlined_call_operand.vmem [shape: f32[1,128], index: 5, kind: input, shape index: {}]   ;;  %s3651_s6 = inlined_call_operand.vmem [shape: f32[64,128], index: 6, kind: output, shape index: {}]  }
   0x1   :  { %v91_v0 = vld [vmem:[%s3645_s1 + $0x1e0] sm:$0xff]  ;;  %v94_v1 = vld [vmem:[%s3645_s1 + $0x1f8] sm:$0xff]  ;;  %v92_v49 = vld [vmem:[%s3645_s1 + $0x1e8] sm:$0xff] }
   0x2   :  { %v87_v2 = vld [vmem:[%s3645_s1 + $0x1c0] sm:$0xff]  ;;  %105 = vmatpush.msra.mxu1 %v91_v0  ;;  %1686 = vmatpush.msra.mxu2 %v91_v0  ;;  %v90_v3 = vld [vmem:[%s3645_s1 + $0x1d8] sm:$0xff]  ;;  %v93_v50 = vld [vmem:[%s3645_s1 + $0x1f0] sm:$0xff] }
   0x3   :  { %v1963_v4 = vld [vmem:[%s3646_s2 + $0x1e0] sm:$0xff]  ;;  %228 = vmatpush.msra.mxu3 %v94_v1  ;;  %v86_v7 = vld [vmem:[%s3645_s1 + $0x1b8] sm:$0xff]  ;;  %v88_v52 = vld [vmem:[%s3645_s1 + $0x1c8] sm:$0xff] }
   0x4   :  { %369 = vmatpush.msra.mxu0 %v1963_v4  ;;  %v83_v5 = vld [vmem:[%s3645_s1 + $0x1a0] sm:$0xff]  ;;  %106 = vmatpush.msra.mxu1 %v87_v2  ;;  %v82_v10 = vld [vmem:[%s3645_s1 + $0x198] sm:$0xff]  ;;  %v89_v53 = vld [vmem:[%s3645_s1 + $0x1d0] sm:$0xff] }
   0x5   :  { %v1972_v6 = vld [vmem:[%s3646_s2 + $0x1c0] sm:$0xff]  ;;  %1687 = vmatpush.msra.mxu2 %v87_v2  ;;  %229 = vmatpush.msra.mxu3 %v90_v3  ;;  %v78_v13 = vld [vmem:[%s3645_s1 + $0x178] sm:$0xff]  ;;  %v84_v54 = vld [vmem:[%s3645_s1 + $0x1a8] sm:$0xff] }
   0x6   :  { %v1980_v8 = vld [vmem:[%s3646_s2 + $0x1a0] sm:$0xff]  ;;  %370 = vmatpush.msra.mxu0 %v1972_v6  ;;  %107 = vmatpush.msra.mxu1 %v83_v5  ;;  %v74_v16 = vld [vmem:[%s3645_s1 + $0x158] sm:$0xff]  ;;  %v85_v56 = vld [vmem:[%s3645_s1 + $0x1b0] sm:$0xff] }
   0x7   :  { %v79_v9 = vld [vmem:[%s3645_s1 + $0x180] sm:$0xff]  ;;  %1688 = vmatpush.msra.mxu2 %v83_v5  ;;  %230 = vmatpush.msra.mxu3 %v86_v7  ;;  %v70_v19 = vld [vmem:[%s3645_s1 + $0x138] sm:$0xff]  ;;  %v80_v58 = vld [vmem:[%s3645_s1 + $0x188] sm:$0xff] }
   0x8   :  { %v1992_v11 = vld [vmem:[%s3646_s2 + $0x180] sm:$0xff]  ;;  %371 = vmatpush.msra.mxu0 %v1980_v8  ;;  %108 = vmatpush.msra.mxu1 %v79_v9  ;;  %v66_v22 = vld [vmem:[%s3645_s1 + $0x118] sm:$0xff]  ;;  %v81_v60 = vld [vmem:[%s3645_s1 + $0x190] sm:$0xff] }
   0x9   :  { %v75_v12 = vld [vmem:[%s3645_s1 + $0x160] sm:$0xff]  ;;  %1689 = vmatpush.msra.mxu2 %v79_v9  ;;  %231 = vmatpush.msra.mxu3 %v82_v10  ;;  %v62_v25 = vld [vmem:[%s3645_s1 + $0xf8] sm:$0xff]  ;;  %v2191_v61 = vld [vmem:[%s3647_s0 + $0x8] sm:$0xff] }
   0xa   :  { %v2004_v14 = vld [vmem:[%s3646_s2 + $0x160] sm:$0xff]  ;;  %372 = vmatpush.msra.mxu0 %v1992_v11  ;;  %109 = vmatpush.msra.mxu1 %v75_v12  ;;  %v58_v28 = vld [vmem:[%s3645_s1 + $0xd8] sm:$0xff]  ;;  %v2197_v62 = vld [vmem:[%s3647_s0 + $0x28] sm:$0xff] }
   0xb   :  { %v71_v15 = vld [vmem:[%s3645_s1 + $0x140] sm:$0xff]  ;;  %1690 = vmatpush.msra.mxu2 %v75_v12  ;;  %232 = vmatpush.msra.mxu3 %v78_v13  ;;  %v54_v31 = vld [vmem:[%s3645_s1 + $0xb8] sm:$0xff]  ;;  %v76_v63 = vld [vmem:[%s3645_s1 + $0x168] sm:$0xff] }
   0xc   :  { %v2016_v17 = vld [vmem:[%s3646_s2 + $0x140] sm:$0xff]  ;;  %373 = vmatpush.msra.mxu0 %v2004_v14  ;;  %110 = vmatpush.msra.mxu1 %v71_v15  ;;  %v50_v34 = vld [vmem:[%s3645_s1 + $0x98] sm:$0xff]  ;;  %v77_v0 = vld [vmem:[%s3645_s1 + $0x170] sm:$0xff] }
   0xd   :  { %v67_v18 = vld [vmem:[%s3645_s1 + $0x120] sm:$0xff]  ;;  %1691 = vmatpush.msra.mxu2 %v71_v15  ;;  %233 = vmatpush.msra.mxu3 %v74_v16  ;;  %v46_v37 = vld [vmem:[%s3645_s1 + $0x78] sm:$0xff]  ;;  %v72_v1 = vld [vmem:[%s3645_s1 + $0x148] sm:$0xff] }
   0xe   :  { %v2028_v20 = vld [vmem:[%s3646_s2 + $0x120] sm:$0xff]  ;;  %374 = vmatpush.msra.mxu0 %v2016_v17  ;;  %111 = vmatpush.msra.mxu1 %v67_v18  ;;  %v42_v40 = vld [vmem:[%s3645_s1 + $0x58] sm:$0xff]  ;;  %v73_v3 = vld [vmem:[%s3645_s1 + $0x150] sm:$0xff] }
   0xf   :  { %v63_v21 = vld [vmem:[%s3645_s1 + $0x100] sm:$0xff]  ;;  %1692 = vmatpush.msra.mxu2 %v67_v18  ;;  %234 = vmatpush.msra.mxu3 %v70_v19  ;;  %v38_v43 = vld [vmem:[%s3645_s1 + $0x38] sm:$0xff]  ;;  %v68_v5 = vld [vmem:[%s3645_s1 + $0x128] sm:$0xff] }
  0x10   :  { %v2040_v23 = vld [vmem:[%s3646_s2 + $0x100] sm:$0xff]  ;;  %375 = vmatpush.msra.mxu0 %v2028_v20  ;;  %112 = vmatpush.msra.mxu1 %v63_v21  ;;  %v34_v46 = vld [vmem:[%s3645_s1 + $0x18] sm:$0xff]  ;;  %v69_v9 = vld [vmem:[%s3645_s1 + $0x130] sm:$0xff] }
  0x11   :  { %v59_v24 = vld [vmem:[%s3645_s1 + $0xe0] sm:$0xff]  ;;  %1693 = vmatpush.msra.mxu2 %v63_v21  ;;  %235 = vmatpush.msra.mxu3 %v66_v22  ;;  %v2170_v55 = vld [vmem:[%s3646_s2 + $0x1f8] sm:$0xff]  ;;  %v64_v10 = vld [vmem:[%s3645_s1 + $0x108] sm:$0xff] }
  0x12   :  { %v2052_v26 = vld [vmem:[%s3646_s2 + $0xe0] sm:$0xff]  ;;  %376 = vmatpush.msra.mxu0 %v2040_v23  ;;  %113 = vmatpush.msra.mxu1 %v59_v24  ;;  %v2183_v59 = vld [vmem:[%s3646_s2 + $0x1d8] sm:$0xff]  ;;  %v65_v13 = vld [vmem:[%s3645_s1 + $0x110] sm:$0xff] }
  0x13   :  { %v55_v27 = vld [vmem:[%s3645_s1 + $0xc0] sm:$0xff]  ;;  %1694 = vmatpush.msra.mxu2 %v59_v24  ;;  %236 = vmatpush.msra.mxu3 %v62_v25  ;;  %v2214_v2 = vld [vmem:[%s3646_s2 + $0x1b8] sm:$0xff]  ;;  %v2248_v15 = vld [vmem:[%s3647_s0 + $0x10] sm:$0xff] }
  0x14   :  { %v2064_v29 = vld [vmem:[%s3646_s2 + $0xc0] sm:$0xff]  ;;  %377 = vmatpush.msra.mxu0 %v2052_v26  ;;  %114 = vmatpush.msra.mxu1 %v55_v27  ;;  %v2227_v7 = vld [vmem:[%s3646_s2 + $0x198] sm:$0xff]  ;;  %v2254_v16 = vld [vmem:[%s3647_s0 + $0x30] sm:$0xff] }
  0x15   :  { %3732 = vst [vmem:[#allocation4_spill] sm:$0xff] %v2064_v29  ;;  %v51_v30 = vld [vmem:[%s3645_s1 + $0xa0] sm:$0xff]  ;;  %1695 = vmatpush.msra.mxu2 %v55_v27  ;;  %237 = vmatpush.msra.mxu3 %v58_v28  ;;  %v2239_v12 = vld [vmem:[%s3646_s2 + $0x178] sm:$0xff]  ;;  %v60_v18 = vld [vmem:[%s3645_s1 + $0xe8] sm:$0xff] }
  0x16   :  { %v2076_v32 = vld [vmem:[%s3646_s2 + $0xa0] sm:$0xff]  ;;  %378 = vmatpush.msra.mxu0 %v2064_v29  ;;  %115 = vmatpush.msra.mxu1 %v51_v30  ;;  %v61_v19 = vld [vmem:[%s3645_s1 + $0xf0] sm:$0xff]  ;;  %v56_v21 = vld [vmem:[%s3645_s1 + $0xc8] sm:$0xff] }
  0x17   :  { %3733 = vst [vmem:[#allocation5_spill] sm:$0xff] %v2076_v32  ;;  %v47_v33 = vld [vmem:[%s3645_s1 + $0x80] sm:$0xff]  ;;  %1696 = vmatpush.msra.mxu2 %v51_v30  ;;  %238 = vmatpush.msra.mxu3 %v54_v31  ;;  %v2271_v22 = vld [vmem:[%s3646_s2 + $0x158] sm:$0xff]  ;;  %v57_v24 = vld [vmem:[%s3645_s1 + $0xd0] sm:$0xff] }
  0x18   :  { %v2088_v35 = vld [vmem:[%s3646_s2 + $0x80] sm:$0xff]  ;;  %379 = vmatpush.msra.mxu0 %v2076_v32  ;;  %116 = vmatpush.msra.mxu1 %v47_v33  ;;  %v52_v25 = vld [vmem:[%s3645_s1 + $0xa8] sm:$0xff]  ;;  %v2284_v27 = vld [vmem:[%s3646_s2 + $0x138] sm:$0xff] }
  0x19   :  { %3734 = vst [vmem:[#allocation6_spill] sm:$0xff] %v2088_v35  ;;  %v43_v36 = vld [vmem:[%s3645_s1 + $0x60] sm:$0xff]  ;;  %1697 = vmatpush.msra.mxu2 %v47_v33  ;;  %239 = vmatpush.msra.mxu3 %v50_v34  ;;  %v53_v28 = vld [vmem:[%s3645_s1 + $0xb0] sm:$0xff]  ;;  %v48_v30 = vld [vmem:[%s3645_s1 + $0x88] sm:$0xff] }
  0x1a   :  { %v2100_v38 = vld [vmem:[%s3646_s2 + $0x60] sm:$0xff]  ;;  %380 = vmatpush.msra.mxu0 %v2088_v35  ;;  %117 = vmatpush.msra.mxu1 %v43_v36  ;;  %v2296_v31 = vld [vmem:[%s3646_s2 + $0x118] sm:$0xff]  ;;  %v49_v33 = vld [vmem:[%s3645_s1 + $0x90] sm:$0xff] }
  0x1b   :  { %3735 = vst [vmem:[#allocation7_spill] sm:$0xff] %v2100_v38  ;;  %v39_v39 = vld [vmem:[%s3645_s1 + $0x40] sm:$0xff]  ;;  %1698 = vmatpush.msra.mxu2 %v43_v36  ;;  %240 = vmatpush.msra.mxu3 %v46_v37  ;;  %v2305_v34 = vld [vmem:[%s3647_s0 + $0x18] sm:$0xff]  ;;  %v44_v37 = vld [vmem:[%s3645_s1 + $0x68] sm:$0xff] }
  0x1c   :  { %v2112_v41 = vld [vmem:[%s3646_s2 + $0x40] sm:$0xff]  ;;  %381 = vmatpush.msra.mxu0 %v2100_v38  ;;  %118 = vmatpush.msra.mxu1 %v39_v39  ;;  %v2311_v36 = vld [vmem:[%s3647_s0 + $0x38] sm:$0xff] }
  0x1d   :  { %3736 = vst [vmem:[#allocation8_spill] sm:$0xff] %v2112_v41  ;;  %v35_v42 = vld [vmem:[%s3645_s1 + $0x20] sm:$0xff]  ;;  %1699 = vmatpush.msra.mxu2 %v39_v39  ;;  %241 = vmatpush.msra.mxu3 %v42_v40  ;;  %v45_v39 = vld [vmem:[%s3645_s1 + $0x70] sm:$0xff]  ;;  %v40_v40 = vld [vmem:[%s3645_s1 + $0x48] sm:$0xff] }
  0x1e   :  { %v2124_v44 = vld [vmem:[%s3646_s2 + $0x20] sm:$0xff]  ;;  %382 = vmatpush.msra.mxu0 %v2112_v41  ;;  %119 = vmatpush.msra.mxu1 %v35_v42 }
  0x1f   :  { %v31_v45 = vld [vmem:[%s3645_s1] sm:$0xff]  ;;  %1700 = vmatpush.msra.mxu2 %v35_v42  ;;  %242 = vmatpush.msra.mxu3 %v38_v43  ;;  %v2328_v42 = vld [vmem:[%s3646_s2 + $0xf8] sm:$0xff]  ;;  %v41_v43 = vld [vmem:[%s3645_s1 + $0x50] sm:$0xff] }
  0x20   :  { %v2136_v47 = vld [vmem:[%s3647_s0] sm:$0xff]  ;;  %383 = vmatpush.msra.mxu0 %v2124_v44  ;;  %120 = vmatpush.msra.mxu1 %v31_v45 }
  0x21   :  { %v2142_v48 = vld [vmem:[%s3647_s0 + $0x20] sm:$0xff]  ;;  %1701 = vmatpush.msra.mxu2 %v31_v45  ;;  %243 = vmatpush.msra.mxu3 %v34_v46  ;;  %v36_v45 = vld [vmem:[%s3645_s1 + $0x28] sm:$0xff]  ;;  %v2341_v46 = vld [vmem:[%s3646_s2 + $0xd8] sm:$0xff] }
  0x22   :  { %121 = vmatmul.f32.vlgmr.msra.gmra.mxu1 %v2136_v47  ;;  %v2154_v51 = vld [vmem:[%s3646_s2] sm:$0xff]  ;;  %133 = vmatmul.f32.vlgmr.msra.gmra.mxu2 %v2142_v48 }
  0x23   :  { %146 = vmatpush.msrb.mxu1 %v92_v49  ;;  %244 = vmatmul.f32.vlgmr.msra.gmra.mxu3 %v2136_v47  ;;  %v37_v49 = vld [vmem:[%s3645_s1 + $0x30] sm:$0xff] }
  0x24   :  { %187 = vmatpush.msrb.mxu2 %v93_v50  ;;  %384 = vmatpush.msra.mxu0 %v2154_v51  ;;  %v32_v50 = vld [vmem:[%s3645_s1 + $0x8] sm:$0xff] }
  0x25   :  { %147 = vmatpush.msrb.mxu1 %v88_v52  ;;  %385 = vmatmul.f32.vlgmr.msra.gmra.mxu0 %v3652_v57  ;;  %v2353_v52 = vld [vmem:[%s3646_s2 + $0xb8] sm:$0xff]  ;;  %v2571_v57 = vld [vmem:[%s3646_s2 + $0x70] sm:$0xff] }
  0x26   :  { %188 = vmatpush.msrb.mxu2 %v89_v53  ;;  %429 = vmatpush.msrb.mxu3 %v2170_v55  ;;  %v33_v53 = vld [vmem:[%s3645_s1 + $0x10] sm:$0xff]  ;;  %3742 = vst [vmem:[#allocation14_spill] sm:$0xff] %v2571_v57 }
  0x27   :  { %148 = vmatpush.msrb.mxu1 %v84_v54  ;;  %521 = vmatpush.msrb.mxu0 %v1963_v4  ;;  %v2363_v54 = vld [vmem:[%s3646_s2 + $0x1e8] sm:$0xff] }
  0x28   :  { %189 = vmatpush.msrb.mxu2 %v85_v56  ;;  %430 = vmatpush.msrb.mxu3 %v2183_v59  ;;  %v2369_v56 = vld [vmem:[%s3646_s2 + $0x1f0] sm:$0xff] }
  0x29   :  { %149 = vmatpush.msrb.mxu1 %v80_v58  ;;  %522 = vmatpush.msrb.mxu0 %v1972_v6  ;;  %v2376_v58 = vld [vmem:[%s3646_s2 + $0x1c8] sm:$0xff] }
  0x2a   :  { %190 = vmatpush.msrb.mxu2 %v81_v60  ;;  %124 = vmatmul.f32.gmra.mxu1 %v2191_v61  ;;  %v2381_v60 = vld [vmem:[%s3646_s2 + $0x98] sm:$0xff] }
  0x2b   :  { %136 = vmatmul.f32.gmra.mxu2 %v2197_v62  ;;  %150 = vmatpush.msrb.mxu1 %v76_v63  ;;  %v2388_v63 = vld [vmem:[%s3646_s2 + $0x1d0] sm:$0xff] }
  0x2c   :  { %247 = vmatmul.f32.gmra.mxu3 %v2191_v61  ;;  %191 = vmatpush.msrb.mxu2 %v77_v0  ;;  %v2394_v0 = vld [vmem:[%s3646_s2 + $0x1a8] sm:$0xff] }
  0x2d   :  { %151 = vmatpush.msrb.mxu1 %v72_v1  ;;  %431 = vmatpush.msrb.mxu3 %v2214_v2  ;;  %v2406_v1 = vld [vmem:[%s3646_s2 + $0x1b0] sm:$0xff] }
  0x2e   :  { %192 = vmatpush.msrb.mxu2 %v73_v3  ;;  %523 = vmatpush.msrb.mxu0 %v1980_v8  ;;  %v2412_v3 = vld [vmem:[%s3646_s2 + $0x188] sm:$0xff] }
  0x2f   :  { %152 = vmatpush.msrb.mxu1 %v68_v5  ;;  %432 = vmatpush.msrb.mxu3 %v2227_v7  ;;  %v2418_v5 = vld [vmem:[%s3646_s2 + $0x58] sm:$0xff] }
  0x30   :  { %193 = vmatpush.msrb.mxu2 %v69_v9  ;;  %524 = vmatpush.msrb.mxu0 %v1992_v11  ;;  %3738 = vst [vmem:[#allocation10_spill] sm:$0xff] %v2418_v5  ;;  %v2426_v9 = vld [vmem:[%s3646_s2 + $0x190] sm:$0xff] }
  0x31   :  { %153 = vmatpush.msrb.mxu1 %v64_v10  ;;  %433 = vmatpush.msrb.mxu3 %v2239_v12  ;;  %v2431_v10 = vld [vmem:[%s3646_s2 + $0x168] sm:$0xff] }
  0x32   :  { %194 = vmatpush.msrb.mxu2 %v65_v13  ;;  %127 = vmatmul.f32.gmra.mxu1 %v2248_v15  ;;  %v2440_v13 = vld [vmem:[%s3646_s2 + $0x170] sm:$0xff] }
  0x33   :  { %139 = vmatmul.f32.gmra.mxu2 %v2254_v16  ;;  %154 = vmatpush.msrb.mxu1 %v60_v18  ;;  %v2446_v18 = vld [vmem:[%s3646_s2 + $0x148] sm:$0xff] }
  0x34   :  { %250 = vmatmul.f32.gmra.mxu3 %v2248_v15  ;;  %195 = vmatpush.msrb.mxu2 %v61_v19  ;;  %v2452_v19 = vld [vmem:[%s3646_s2 + $0x38] sm:$0xff] }
  0x35   :  { %155 = vmatpush.msrb.mxu1 %v56_v21  ;;  %434 = vmatpush.msrb.mxu3 %v2271_v22  ;;  %3739 = vst [vmem:[#allocation11_spill] sm:$0xff] %v2452_v19  ;;  %v2459_v21 = vld [vmem:[%s3646_s2 + $0x150] sm:$0xff] }
  0x36   :  { %196 = vmatpush.msrb.mxu2 %v57_v24  ;;  %525 = vmatpush.msrb.mxu0 %v2004_v14  ;;  %v2465_v24 = vld [vmem:[%s3646_s2 + $0x128] sm:$0xff] }
  0x37   :  { %156 = vmatpush.msrb.mxu1 %v52_v25  ;;  %435 = vmatpush.msrb.mxu3 %v2284_v27  ;;  %v2478_v25 = vld [vmem:[%s3646_s2 + $0x130] sm:$0xff] }
  0x38   :  { %197 = vmatpush.msrb.mxu2 %v53_v28  ;;  %526 = vmatpush.msrb.mxu0 %v2016_v17  ;;  %v2483_v28 = vld [vmem:[%s3646_s2 + $0x108] sm:$0xff] }
  0x39   :  { %157 = vmatpush.msrb.mxu1 %v48_v30  ;;  %436 = vmatpush.msrb.mxu3 %v2296_v31  ;;  %v2492_v30 = vld [vmem:[%s3646_s2 + $0x110] sm:$0xff] }
  0x3a   :  { %198 = vmatpush.msrb.mxu2 %v49_v33  ;;  %130 = vmatmul.f32.gmra.mxu1 %v2305_v34  ;;  %v2497_v33 = vld [vmem:[%s3646_s2 + $0xe8] sm:$0xff] }
  0x3b   :  { %142 = vmatmul.f32.gmra.mxu2 %v2311_v36  ;;  %158 = vmatpush.msrb.mxu1 %v44_v37  ;;  %v2505_v37 = vld [vmem:[%s3646_s2 + $0xf0] sm:$0xff] }
  0x3c   :  { %253 = vmatmul.f32.gmra.mxu3 %v2305_v34  ;;  %199 = vmatpush.msrb.mxu2 %v45_v39  ;;  %v2512_v39 = vld [vmem:[%s3646_s2 + $0xc8] sm:$0xff] }
  0x3d   :  { %159 = vmatpush.msrb.mxu1 %v40_v40  ;;  %437 = vmatpush.msrb.mxu3 %v2328_v42  ;;  %v2520_v40 = vld [vmem:[%s3646_s2 + $0xd0] sm:$0xff] }
  0x3e   :  { %200 = vmatpush.msrb.mxu2 %v41_v43  ;;  %527 = vmatpush.msrb.mxu0 %v2028_v20  ;;  %v2526_v43 = vld [vmem:[%s3646_s2 + $0xa8] sm:$0xff] }
  0x3f   :  { %160 = vmatpush.msrb.mxu1 %v36_v45  ;;  %438 = vmatpush.msrb.mxu3 %v2341_v46  ;;  %v2539_v45 = vld [vmem:[%s3646_s2 + $0x88] sm:$0xff] }
  0x40   :  { %201 = vmatpush.msrb.mxu2 %v37_v49  ;;  %528 = vmatpush.msrb.mxu0 %v2040_v23  ;;  %v2547_v49 = vld [vmem:[%s3646_s2 + $0x90] sm:$0xff] }
  0x41   :  { %161 = vmatpush.msrb.mxu1 %v32_v50  ;;  %439 = vmatpush.msrb.mxu3 %v2353_v52  ;;  %v2553_v50 = vld [vmem:[%s3646_s2 + $0x68] sm:$0xff] }
  0x42   :  { %202 = vmatpush.msrb.mxu2 %v33_v53  ;;  %162 = vmatmul.f32.vlgmr.msrb.gmra.mxu1 %v2136_v47  ;;  %v2563_v53 = vld [vmem:[%s3646_s2 + $0x48] sm:$0xff] }
  0x43   :  { %203 = vmatmul.f32.vlgmr.msrb.gmra.mxu2 %v2136_v47  ;;  %389 = vmatpush.msra.mxu1 %v2363_v54  ;;  %v2400_v47 = vld [vmem:[%s3646_s2 + $0x78] sm:$0xff]  ;;  %3741 = vst [vmem:[#allocation13_spill] sm:$0xff] %v2563_v53 }
  0x44   :  { %256 = vmatmul.f32.gmra.mxu3 %v2142_v48  ;;  %409 = vmatpush.msra.mxu2 %v2369_v56  ;;  %3737 = vst [vmem:[#allocation9_spill] sm:$0xff] %v2400_v47 }
  0x45   :  { %390 = vmatpush.msra.mxu1 %v2376_v58  ;;  %440 = vmatpush.msrb.mxu3 %v2381_v60 }
  0x46   :  { %410 = vmatpush.msra.mxu2 %v2388_v63  ;;  %529 = vmatpush.msrb.mxu0 %v2052_v26 }
  0x47   :  { %391 = vmatpush.msra.mxu1 %v2394_v0  ;;  %441 = vmatpush.msrb.mxu3 %v2400_v47 }
  0x48   :  { %411 = vmatpush.msra.mxu2 %v2406_v1  ;;  %530 = vmatpush.msrb.mxu0 %v2064_v29  ;;  %v2603_v29 = vld [vmem:[%s3646_s2 + $0x10] sm:$0xff] }
  0x49   :  { %392 = vmatpush.msra.mxu1 %v2412_v3  ;;  %442 = vmatpush.msrb.mxu3 %v2418_v5  ;;  %3747 = vst [vmem:[#allocation19_spill] sm:$0xff] %v2603_v29 }
  0x4a   :  { %165 = vmatmul.f32.gmra.mxu1 %v2191_v61  ;;  %412 = vmatpush.msra.mxu2 %v2426_v9 }
  0x4b   :  { %206 = vmatmul.f32.gmra.mxu2 %v2191_v61  ;;  %393 = vmatpush.msra.mxu1 %v2431_v10  ;;  %v2471_v61 = vld [vmem:[%s3646_s2 + $0x18] sm:$0xff] }
  0x4c   :  { %259 = vmatmul.f32.gmra.mxu3 %v2197_v62  ;;  %413 = vmatpush.msra.mxu2 %v2440_v13  ;;  %3740 = vst [vmem:[#allocation12_spill] sm:$0xff] %v2471_v61 }
  0x4d   :  { %394 = vmatpush.msra.mxu1 %v2446_v18  ;;  %443 = vmatpush.msrb.mxu3 %v2452_v19 }
  0x4e   :  { %414 = vmatpush.msra.mxu2 %v2459_v21  ;;  %531 = vmatpush.msrb.mxu0 %v2076_v32  ;;  %v2596_v32 = vld [vmem:[%s3646_s2 + $0x8] sm:$0xff] }
  0x4f   :  { %395 = vmatpush.msra.mxu1 %v2465_v24  ;;  %444 = vmatpush.msrb.mxu3 %v2471_v61  ;;  %3746 = vst [vmem:[#allocation18_spill] sm:$0xff] %v2596_v32 }
  0x50   :  { %415 = vmatpush.msra.mxu2 %v2478_v25  ;;  %532 = vmatpush.msrb.mxu0 %v2088_v35  ;;  %v2582_v35 = vld [vmem:[%s3646_s2 + $0x28] sm:$0xff] }
  0x51   :  { %581 = vmatpush.msra.mxu3 %v2170_v55  ;;  %396 = vmatpush.msra.mxu1 %v2483_v28  ;;  %3744 = vst [vmem:[#allocation16_spill] sm:$0xff] %v2582_v35 }
  0x52   :  { %168 = vmatmul.f32.gmra.mxu1 %v2248_v15  ;;  %416 = vmatpush.msra.mxu2 %v2492_v30 }
  0x53   :  { %209 = vmatmul.f32.gmra.mxu2 %v2248_v15  ;;  %397 = vmatpush.msra.mxu1 %v2497_v33  ;;  %v2533_v15 = vld [vmem:[%s3646_s2 + $0xb0] sm:$0xff] }
  0x54   :  { %262 = vmatmul.f32.gmra.mxu3 %v2254_v16  ;;  %417 = vmatpush.msra.mxu2 %v2505_v37 }
  0x55   :  { %398 = vmatpush.msra.mxu1 %v2512_v39  ;;  %582 = vmatpush.msra.mxu3 %v2183_v59 }
  0x56   :  { %418 = vmatpush.msra.mxu2 %v2520_v40  ;;  %533 = vmatpush.msrb.mxu0 %v2100_v38  ;;  %v2576_v38 = vld [vmem:[%s3646_s2 + $0x50] sm:$0xff] }
  0x57   :  { %399 = vmatpush.msra.mxu1 %v2526_v43  ;;  %583 = vmatpush.msra.mxu3 %v2214_v2  ;;  %3743 = vst [vmem:[#allocation15_spill] sm:$0xff] %v2576_v38 }
  0x58   :  { %419 = vmatpush.msra.mxu2 %v2533_v15  ;;  %534 = vmatpush.msrb.mxu0 %v2112_v41  ;;  %v3748_v41 = vmov 0.0  }
  0x59   :  { %400 = vmatpush.msra.mxu1 %v2539_v45  ;;  %584 = vmatpush.msra.mxu3 %v2227_v7 }
  0x5a   :  { %171 = vmatmul.f32.gmra.mxu1 %v2305_v34  ;;  %420 = vmatpush.msra.mxu2 %v2547_v49 }
  0x5b   :  { %212 = vmatmul.f32.gmra.mxu2 %v2305_v34  ;;  %401 = vmatpush.msra.mxu1 %v2553_v50  ;;  %v2589_v34 = vld [vmem:[%s3646_s2 + $0x30] sm:$0xff] }
  0x5c   :  { %265 = vmatmul.f32.gmra.mxu3 %v2311_v36  ;;  %421 = vmatpush.msra.mxu2 %v2571_v57  ;;  %3745 = vst [vmem:[#allocation17_spill] sm:$0xff] %v2589_v34 }
  0x5d   :  { %402 = vmatpush.msra.mxu1 %v2563_v53  ;;  %585 = vmatpush.msra.mxu3 %v2239_v12 }
  0x5e   :  { %422 = vmatpush.msra.mxu2 %v2576_v38  ;;  %535 = vmatpush.msrb.mxu0 %v2124_v44 }
  0x5f   :  { %403 = vmatpush.msra.mxu1 %v2582_v35  ;;  %586 = vmatpush.msra.mxu3 %v2271_v22 }
  0x60   :  { %423 = vmatpush.msra.mxu2 %v2589_v34  ;;  %536 = vmatpush.msrb.mxu0 %v2154_v51 }
  0x61   :  { %404 = vmatpush.msra.mxu1 %v2596_v32  ;;  %587 = vmatpush.msra.mxu3 %v2284_v27 }
  0x62   :  { %174 = vmatmul.f32.gmra.mxu1 %v2142_v48  ;;  %424 = vmatpush.msra.mxu2 %v2603_v29 }
  0x63   :  { %215 = vmatmul.f32.gmra.mxu2 %v2142_v48  ;;  %541 = vmatpush.msrb.mxu1 %v2363_v54 }
  0x64   :  { %445 = vmatmul.f32.vlgmr.msrb.gmra.mxu3 %v3748_v41  ;;  %561 = vmatpush.msrb.mxu2 %v2369_v56 }
  0x65   :  { %542 = vmatpush.msrb.mxu1 %v2376_v58  ;;  %588 = vmatpush.msra.mxu3 %v2296_v31 }
  0x66   :  { %562 = vmatpush.msrb.mxu2 %v2388_v63  ;;  %673 = vmatpush.msra.mxu0 %v1963_v4  ;;  %v3749_v4 = vld [vmem:[#allocation4_spill] sm:$0xff] }
  0x67   :  { %543 = vmatpush.msrb.mxu1 %v2394_v0  ;;  %589 = vmatpush.msra.mxu3 %v2328_v42 }
  0x68   :  { %563 = vmatpush.msrb.mxu2 %v2406_v1  ;;  %674 = vmatpush.msra.mxu0 %v1972_v6  ;;  %v3750_v6 = vld [vmem:[#allocation5_spill] sm:$0xff] }
  0x69   :  { %544 = vmatpush.msrb.mxu1 %v2412_v3  ;;  %590 = vmatpush.msra.mxu3 %v2341_v46 }
  0x6a   :  { %177 = vmatmul.f32.gmra.mxu1 %v2197_v62  ;;  %564 = vmatpush.msrb.mxu2 %v2426_v9 }
  0x6b   :  { %218 = vmatmul.f32.gmra.mxu2 %v2197_v62  ;;  %545 = vmatpush.msrb.mxu1 %v2431_v10 }
  0x6c   :  { %565 = vmatpush.msrb.mxu2 %v2440_v13  ;;  %591 = vmatpush.msra.mxu3 %v2353_v52 }
  0x6d   :  { %546 = vmatpush.msrb.mxu1 %v2446_v18  ;;  %675 = vmatpush.msra.mxu0 %v1980_v8  ;;  %v3751_v8 = vld [vmem:[#allocation6_spill] sm:$0xff] }
  0x6e   :  { %566 = vmatpush.msrb.mxu2 %v2459_v21  ;;  %592 = vmatpush.msra.mxu3 %v2381_v60 }
  0x6f   :  { %547 = vmatpush.msrb.mxu1 %v2465_v24  ;;  %676 = vmatpush.msra.mxu0 %v1992_v11  ;;  %v3752_v11 = vld [vmem:[#allocation7_spill] sm:$0xff] }
  0x70   :  { %567 = vmatpush.msrb.mxu2 %v2478_v25  ;;  %593 = vmatpush.msra.mxu3 %v2400_v47 }
  0x71   :  { %548 = vmatpush.msrb.mxu1 %v2483_v28  ;;  %677 = vmatpush.msra.mxu0 %v2004_v14  ;;  %v3753_v14 = vld [vmem:[#allocation8_spill] sm:$0xff] }
  0x72   :  { %180 = vmatmul.f32.gmra.mxu1 %v2254_v16  ;;  %568 = vmatpush.msrb.mxu2 %v2492_v30 }
  0x73   :  { %221 = vmatmul.f32.gmra.mxu2 %v2254_v16  ;;  %549 = vmatpush.msrb.mxu1 %v2497_v33 }
  0x74   :  { %569 = vmatpush.msrb.mxu2 %v2505_v37  ;;  %594 = vmatpush.msra.mxu3 %v2418_v5 }
  0x75   :  { %550 = vmatpush.msrb.mxu1 %v2512_v39  ;;  %678 = vmatpush.msra.mxu0 %v2016_v17 }
  0x76   :  { %570 = vmatpush.msrb.mxu2 %v2520_v40  ;;  %595 = vmatpush.msra.mxu3 %v2452_v19 }
  0x77   :  { %551 = vmatpush.msrb.mxu1 %v2526_v43  ;;  %679 = vmatpush.msra.mxu0 %v2028_v20  ;;  %v95_v20 = vld [vmem:[%s3648_s3] sm:$0xf] }
  0x78   :  { %571 = vmatpush.msrb.mxu2 %v2533_v15  ;;  %596 = vmatpush.msra.mxu3 %v2471_v61  ;;  %v100_v62 = vperm.slane %v95_v20, 3 }
  0x79   :  { %552 = vmatpush.msrb.mxu1 %v2539_v45  ;;  %680 = vmatpush.msra.mxu0 %v2040_v23  ;;  %v97_v23 = vperm.slane %v95_v20, 0 }
  0x7a   :  { %733 = vmatpush.msrb.mxu3 %v2170_v55  ;;  %183 = vmatmul.f32.gmra.mxu1 %v2311_v36 }
  0x7b   :  { %572 = vmatpush.msrb.mxu2 %v2547_v49  ;;  %553 = vmatpush.msrb.mxu1 %v2553_v50 }
  0x7c   :  { %224 = vmatmul.f32.gmra.mxu2 %v2311_v36  ;;  %734 = vmatpush.msrb.mxu3 %v2183_v59 }
  0x7d   :  { %573 = vmatpush.msrb.mxu2 %v2571_v57  ;;  %554 = vmatpush.msrb.mxu1 %v2563_v53 }
  0x7e   :  { %735 = vmatpush.msrb.mxu3 %v2214_v2  ;;  %681 = vmatpush.msra.mxu0 %v2052_v26 }
  0x7f   :  { %574 = vmatpush.msrb.mxu2 %v2576_v38  ;;  %555 = vmatpush.msrb.mxu1 %v2582_v35 }
  0x80   :  { %736 = vmatpush.msrb.mxu3 %v2227_v7  ;;  %682 = vmatpush.msra.mxu0 %v3749_v4 }
  0x81   :  { %575 = vmatpush.msrb.mxu2 %v2589_v34  ;;  %556 = vmatpush.msrb.mxu1 %v2596_v32 }
  0x82   :  { %405 = vmatmul.f32.vlgmr.msra.gmra.mxu1 %v3748_v41  ;;  %737 = vmatpush.msrb.mxu3 %v2239_v12 }
  0x83   :  { %576 = vmatpush.msrb.mxu2 %v2603_v29  ;;  %693 = vmatpush.msra.mxu1 %v2363_v54 }
  0x84   :  { %425 = vmatmul.f32.vlgmr.msra.gmra.mxu2 %v3748_v41  ;;  %738 = vmatpush.msrb.mxu3 %v2271_v22 }
  0x85   :  { %713 = vmatpush.msra.mxu2 %v2369_v56  ;;  %694 = vmatpush.msra.mxu1 %v2376_v58 }
  0x86   :  { %683 = vmatpush.msra.mxu0 %v3750_v6  ;;  %739 = vmatpush.msrb.mxu3 %v2284_v27 }
  0x87   :  { %714 = vmatpush.msra.mxu2 %v2388_v63  ;;  %695 = vmatpush.msra.mxu1 %v2394_v0 }
  0x88   :  { %684 = vmatpush.msra.mxu0 %v3751_v8  ;;  %740 = vmatpush.msrb.mxu3 %v2296_v31 }
  0x89   :  { %715 = vmatpush.msra.mxu2 %v2406_v1  ;;  %696 = vmatpush.msra.mxu1 %v2412_v3 }
  0x8a   :  { %685 = vmatpush.msra.mxu0 %v3752_v11  ;;  %741 = vmatpush.msrb.mxu3 %v2328_v42 }
  0x8b   :  { %716 = vmatpush.msra.mxu2 %v2426_v9  ;;  %697 = vmatpush.msra.mxu1 %v2431_v10 }
  0x8c   :  { %686 = vmatpush.msra.mxu0 %v3753_v14  ;;  %742 = vmatpush.msrb.mxu3 %v2341_v46 }
  0x8d   :  { %717 = vmatpush.msra.mxu2 %v2440_v13  ;;  %698 = vmatpush.msra.mxu1 %v2446_v18 }
  0x8e   :  { %687 = vmatpush.msra.mxu0 %v2124_v44  ;;  %743 = vmatpush.msrb.mxu3 %v2353_v52 }
  0x8f   :  { %718 = vmatpush.msra.mxu2 %v2459_v21  ;;  %699 = vmatpush.msra.mxu1 %v2465_v24 }
  0x90   :  { %688 = vmatpush.msra.mxu0 %v2154_v51  ;;  %744 = vmatpush.msrb.mxu3 %v2381_v60 }
  0x91   :  { %719 = vmatpush.msra.mxu2 %v2478_v25  ;;  %700 = vmatpush.msra.mxu1 %v2483_v28 }
  0x92   :  { %745 = vmatpush.msrb.mxu3 %v2400_v47 }
  0x93   :  { %720 = vmatpush.msra.mxu2 %v2492_v30  ;;  %701 = vmatpush.msra.mxu1 %v2497_v33 }
  0x94   :  { %746 = vmatpush.msrb.mxu3 %v2418_v5 }
  0x95   :  { %721 = vmatpush.msra.mxu2 %v2505_v37  ;;  %702 = vmatpush.msra.mxu1 %v2512_v39 }
  0x96   :  { %747 = vmatpush.msrb.mxu3 %v2452_v19 }
  0x97   :  { %722 = vmatpush.msra.mxu2 %v2520_v40  ;;  %703 = vmatpush.msra.mxu1 %v2526_v43 }
  0x98   :  { %748 = vmatpush.msrb.mxu3 %v2471_v61 }
  0x99   :  { %723 = vmatpush.msra.mxu2 %v2533_v15  ;;  %704 = vmatpush.msra.mxu1 %v2539_v45 }
  0x9b   :  { %724 = vmatpush.msra.mxu2 %v2547_v49  ;;  %705 = vmatpush.msra.mxu1 %v2553_v50 }
  0x9d   :  { %725 = vmatpush.msra.mxu2 %v2571_v57  ;;  %706 = vmatpush.msra.mxu1 %v2563_v53 }
  0x9f   :  { %726 = vmatpush.msra.mxu2 %v2576_v38  ;;  %v122_v17 = vpop.f32.mrf.mxu1  ;;  %707 = vmatpush.msra.mxu1 %v2582_v35 }
  0xa1   :  { %727 = vmatpush.msra.mxu2 %v2589_v34  ;;  %708 = vmatpush.msra.mxu1 %v2596_v32 }
  0xa3   :  { %728 = vmatpush.msra.mxu2 %v2603_v29 }
  0xa5   :  { %v134_v26 = vpop.f32.mrf.mxu2 }
  0xa6   :  { %v2731_v41 = vadd.f32 %v134_v26, %v97_v23  ;;  %v245_v44 = vpop.f32.mrf.mxu3 }
  0xa7   :  { %v125_v48 = vpop.f32.mrf.mxu1 }
  0xa8   :  { %3754 = vst [vmem:[#allocation4_spill] sm:$0xff] %v2731_v41  ;;  %v2733_v51 = vadd.f32 %v125_v48, %v97_v23 }
  0xaa   :  { %3755 = vst [vmem:[#allocation5_spill] sm:$0xff] %v2733_v51 }
  0xae   :  { %v137_v16 = vpop.f32.mrf.mxu2 }
  0xaf   :  { %v2735_v36 = vadd.f32 %v137_v16, %v97_v23  ;;  %v248_v4 = vpop.f32.mrf.mxu3  ;;  %v128_v6 = vpop.f32.mrf.mxu1 }
  0xb0   :  { %v2737_v8 = vadd.f32 %v248_v4, %v100_v62  ;;  %v2739_v11 = vadd.f32 %v128_v6, %v97_v23  ;;  %v98_v4 = vperm.slane %v95_v20, 1 }
  0xb1   :  { %3756 = vst [vmem:[#allocation6_spill] sm:$0xff] %v2735_v36 }
  0xb2   :  { %3757 = vst [vmem:[#allocation7_spill] sm:$0xff] %v2737_v8 }
  0xb3   :  { %3758 = vst [vmem:[#allocation8_spill] sm:$0xff] %v2739_v11 }
  0xb6   :  { %v140_v14 = vpop.f32.mrf.mxu2 }
  0xb7   :  { %v2741_v61 = vadd.f32 %v140_v14, %v97_v23  ;;  %v251_v29 = vpop.f32.mrf.mxu3  ;;  %v131_v26 = vpop.f32.mrf.mxu1 }
  0xb8   :  { %v2743_v41 = vadd.f32 %v251_v29, %v100_v62  ;;  %v2745_v32 = vadd.f32 %v131_v26, %v97_v23  ;;  %v99_v29 = vperm.slane %v95_v20, 2 }
  0xb9   :  { %3759 = vst [vmem:[#allocation20_spill] sm:$0xff] %v2741_v61 }
  0xba   :  { %3760 = vst [vmem:[#allocation21_spill] sm:$0xff] %v2743_v41 }
  0xbb   :  { %3761 = vst [vmem:[#allocation22_spill] sm:$0xff] %v2745_v32 }
  0xbe   :  { %v143_v48 = vpop.f32.mrf.mxu2 }
  0xbf   :  { %v2747_v51 = vadd.f32 %v143_v48, %v97_v23  ;;  %v254_v16 = vpop.f32.mrf.mxu3  ;;  %v163_v36 = vpop.f32.mrf.mxu1 }
  0xc0   :  { %v2749_v19 = vadd.f32 %v254_v16, %v100_v62 }
  0xc1   :  { %3762 = vst [vmem:[#allocation23_spill] sm:$0xff] %v2747_v51 }
  0xc2   :  { %3763 = vst [vmem:[#allocation24_spill] sm:$0xff] %v2749_v19 }
  0xc6   :  { %v2751_v8 = vpop.f32.mrf.mxu2 }
  0xc7   :  { %v257_v6 = vpop.f32.mrf.mxu3  ;;  %v166_v11 = vpop.f32.mrf.mxu1 }
  0xc8   :  { %v2753_v14 = vadd.f32 %v257_v6, %v100_v62  ;;  %v2755_v61 = vadd.f32 %v166_v11, %v98_v4 }
  0xca   :  { %3764 = vst [vmem:[#allocation25_spill] sm:$0xff] %v2753_v14 }
  0xcb   :  { %3765 = vst [vmem:[#allocation26_spill] sm:$0xff] %v2755_v61 }
  0xce   :  { %v207_v41 = vpop.f32.mrf.mxu2 }
  0xcf   :  { %v2757_v26 = vadd.f32 %v207_v41, %v99_v29  ;;  %v260_v32 = vpop.f32.mrf.mxu3  ;;  %v169_v48 = vpop.f32.mrf.mxu1 }
  0xd0   :  { %v2759_v51 = vadd.f32 %v260_v32, %v100_v62  ;;  %v2761_v34 = vadd.f32 %v169_v48, %v98_v4 }
  0xd1   :  { %3766 = vst [vmem:[#allocation27_spill] sm:$0xff] %v2757_v26 }
  0xd2   :  { %3767 = vst [vmem:[#allocation28_spill] sm:$0xff] %v2759_v51 }
  0xd3   :  { %3768 = vst [vmem:[#allocation29_spill] sm:$0xff] %v2761_v34 }
  0xd6   :  { %v210_v16 = vpop.f32.mrf.mxu2 }
  0xd7   :  { %v2763_v19 = vadd.f32 %v210_v16, %v99_v29  ;;  %v263_v35 = vpop.f32.mrf.mxu3  ;;  %v172_v5 = vpop.f32.mrf.mxu1 }
  0xd8   :  { %v2765_v38 = vadd.f32 %v263_v35, %v100_v62  ;;  %v2767_v6 = vadd.f32 %v172_v5, %v98_v4  ;;  %v386_v35 = vpop.f32.mrf.mxu0 }
  0xd9   :  { %3769 = vst [vmem:[#allocation30_spill] sm:$0xff] %v2763_v19  ;;  %v123_v19 = vadd.f32 %v122_v17, %v97_v23 }
  0xda   :  { %3770 = vst [vmem:[#allocation31_spill] sm:$0xff] %v2765_v38 }
  0xdb   :  { %3771 = vst [vmem:[#allocation32_spill] sm:$0xff] %v2767_v6  ;;  %v449_v38 = vadd.f32 %v386_v35, %v123_v19  ;;  %v164_v35 = vadd.f32 %v163_v36, %v98_v4  ;;  %v205_v36 = vadd.f32 %v2751_v8, %v99_v29 }
  0xde   :  { %v213_v11 = vpop.f32.mrf.mxu2 }
  0xdf   :  { %v2769_v20 = vadd.f32 %v213_v11, %v99_v29  ;;  %v266_v41 = vpop.f32.mrf.mxu3  ;;  %v175_v14 = vpop.f32.mrf.mxu1 }
  0xe0   :  { %v2771_v26 = vadd.f32 %v266_v41, %v100_v62  ;;  %v2773_v32 = vadd.f32 %v175_v14, %v98_v4  ;;  %v246_v14 = vadd.f32 %v245_v44, %v100_v62 }
  0xe1   :  { %3772 = vst [vmem:[#allocation33_spill] sm:$0xff] %v2769_v20  ;;  %v1662_v20 = vmul.f32 -1.442695, %v449_v38 }
  0xe2   :  { %3773 = vst [vmem:[#allocation34_spill] sm:$0xff] %v2771_v26 }
  0xe3   :  { %3774 = vst [vmem:[#allocation35_spill] sm:$0xff] %v2773_v32  ;;  %1704 = vpow2.f32 %v1662_v20 }
  0xe6   :  { %v216_v48 = vpop.f32.mrf.mxu2 }
  0xe7   :  { %v2775_v51 = vadd.f32 %v216_v48, %v99_v29  ;;  %v178_v16 = vpop.f32.mrf.mxu1  ;;  %v446_v41 = vpop.f32.mrf.mxu3 }
  0xe8   :  { %v2777_v34 = vadd.f32 %v178_v16, %v98_v4  ;;  %v452_v32 = vadd.f32 %v446_v41, %v246_v14 }
  0xe9   :  { %3775 = vst [vmem:[#allocation36_spill] sm:$0xff] %v2775_v51  ;;  %v1705_v23 = vpop.eup %1704 }
  0xea   :  { %3776 = vst [vmem:[#allocation37_spill] sm:$0xff] %v2777_v34  ;;  %v1664_v16 = vmul.f32 -1.442695, %v452_v32  ;;  %v456_v19 = vadd.f32 1.0, %v1705_v23 }
  0xec   :  { %1706 = vpow2.f32 %v1664_v16  ;;  %vm462_vm1 = vweird.f32 %v456_v19 }
  0xed   :  { %1708 = vrcp.f32 %v456_v19 }
  0xee   :  { %v219_v5 = vpop.f32.mrf.mxu2 }
  0xef   :  { %v2779_v6 = vadd.f32 %v219_v5, %v99_v29  ;;  %v181_v11 = vpop.f32.mrf.mxu1 }
  0xf0   :  { %v2781_v61 = vadd.f32 %v181_v11, %v98_v4 }
  0xf1   :  { %3777 = vst [vmem:[#allocation38_spill] sm:$0xff] %v2779_v6 }
  0xf2   :  { %3778 = vst [vmem:[#allocation39_spill] sm:$0xff] %v2781_v61  ;;  %v1707_v44 = vpop.eup %1706 }
  0xf3   :  { %v1709_v62 = vpop.eup %1708 }
  0xf4   :  { %v458_v14 = vmul.f32 %v1709_v62, %v456_v19  ;;  %vm463_vm0 = vweird.f32 %v1709_v62 }
  0xf5   :  { %vm464_vm3 = vmor %vm462_vm1, %vm463_vm0 }
  0xf6   :  { %v222_v26 = vpop.f32.mrf.mxu2  ;;  %v459_v32 = vsub.f32 1.0, %v458_v14 }
  0xf7   :  { %v2783_v48 = vadd.f32 %v222_v26, %v99_v29  ;;  %v184_v51 = vpop.f32.mrf.mxu1  ;;  %v495_v26 = vadd.f32 1.0, %v1707_v44 }
  0xf8   :  { %v2785_v17 = vadd.f32 %v184_v51, %v98_v4 }
  0xf9   :  { %3779 = vst [vmem:[#allocation40_spill] sm:$0xff] %v2783_v48  ;;  %v466_v48 = vand.u32 2147483647, %v456_v19  ;;  %v507_v47 = vand.u32 2147483648, %v495_v26  ;;  %vm501_vm9 = vweird.f32 %v495_v26 }
  0xfa   :  { %3780 = vst [vmem:[#allocation41_spill] sm:$0xff] %v2785_v17  ;;  %v468_v17 = vand.u32 2147483648, %v456_v19 }
  0xfb   :  { %vm467_vm6 = vcmp.eq.f32.partialorder %v466_v48, 8.507059e+37 }
  0xff   :  { %v225_v5 = vpop.f32.mrf.mxu2  ;;  %v406_v38 = vpop.f32.mrf.mxu1 }
 0x100   :  { %v2787_v6 = vadd.f32 %v225_v5, %v99_v29  ;;  %v450_v11 = vadd.f32 %v406_v38, %v164_v35  ;;  %v460_v5 = vmul.f32 %v1709_v62, %v459_v32 }
 0x102   :  { %3781 = vst [vmem:[#allocation42_spill] sm:$0xff] %v2787_v6  ;;  %v1663_v20 = vmul.f32 -1.442695, %v450_v11 }
 0x104   :  { %1710 = vpow2.f32 %v1663_v20  ;;  %v461_v20 = vadd.f32 %v1709_v62, %v460_v5 }
 0x105   :  { %1712 = vrcp.f32 %v495_v26 }
 0x106   :  { %v465_v8 = vsel %vm464_vm3, %v1709_v62, %v461_v20  ;;  %v505_v62 = vand.u32 2147483647, %v495_v26  ;;  %v3790_v20 = vld [vmem:[#allocation10_spill] sm:$0xff] }
 0x107   :  { %v426_v23 = vpop.f32.mrf.mxu2 }
 0x108   :  { %v451_v4 = vadd.f32 %v426_v23, %v205_v36  ;;  %v469_v36 = vor.u32 1.1754944e-38, %v468_v17  ;;  %vm506_vm11 = vcmp.eq.f32.partialorder %v505_v62, 8.507059e+37 }
 0x10a   :  { %v1711_v41 = vpop.eup %1710 }
 0x10b   :  { %v475_v51 = vadd.f32 1.0, %v1711_v41  ;;  %v1713_v16 = vpop.eup %1712 }
 0x10c   :  { %v497_v38 = vmul.f32 %v1713_v16, %v495_v26  ;;  %vm502_vm8 = vweird.f32 %v1713_v16  ;;  %v2919_v26 = vld [vmem:[%s3646_s2 + $0x40] sm:$0xff] }
 0x10d   :  { %1714 = vrcp.f32 %v475_v51  ;;  %v487_v44 = vand.u32 2147483648, %v475_v51  ;;  %v485_v14 = vand.u32 2147483647, %v475_v51  ;;  %vm481_vm4 = vweird.f32 %v475_v51  ;;  %vm503_vm10 = vmor %vm501_vm9, %vm502_vm8 }
 0x10e   :  { %1716 = vtanh.f32 %v451_v4  ;;  %v498_v61 = vsub.f32 1.0, %v497_v38 }
 0x10f   :  { %v488_v23 = vor.u32 1.1754944e-38, %v487_v44  ;;  %vm486_vm7 = vcmp.eq.f32.partialorder %v485_v14, 8.507059e+37  ;;  %v2928_v44 = vld [vmem:[%s3646_s2 + $0x20] sm:$0xff]  ;;  %v3793_v14 = vld [vmem:[#allocation17_spill] sm:$0xff] }
 0x110   :  { %v499_v5 = vmul.f32 %v1713_v16, %v498_v61  ;;  %3791 = vst [vmem:[#allocation10_spill] sm:$0xff] %v2928_v44 }
 0x112   :  { %v500_v38 = vadd.f32 %v1713_v16, %v499_v5 }
 0x113   :  { %v1715_v6 = vpop.eup %1714 }
 0x114   :  { %v477_v35 = vmul.f32 %v1715_v6, %v475_v51  ;;  %vm482_vm2 = vweird.f32 %v1715_v6  ;;  %v1717_v32 = vpop.eup %1716  ;;  %v504_v17 = vsel %vm503_vm10, %v1713_v16, %v500_v38  ;;  %v508_v51 = vor.u32 1.1754944e-38, %v507_v47  ;;  %v2811_v47 = vld [vmem:[%s3646_s2 + $0x1c0] sm:$0xff]  ;;  %v3789_v16 = vld [vmem:[#allocation15_spill] sm:$0xff]  ;;  %v3800_v38 = vld [vmem:[#allocation26_spill] sm:$0xff] }
 0x115   :  { %vm483_vm5 = vmor %vm481_vm4, %vm482_vm2 }
 0x116   :  { %v478_v11 = vsub.f32 1.0, %v477_v35  ;;  %v470_v35 = vsel %vm467_vm6, %v469_v36, %v465_v8  ;;  %v509_v48 = vsel %vm506_vm11, %v508_v51, %v504_v17  ;;  %v3794_v8 = vld [vmem:[#allocation11_spill] sm:$0xff]  ;;  %v3798_v36 = vld [vmem:[#allocation12_spill] sm:$0xff] }
 0x118   :  { %v479_v41 = vmul.f32 %v1715_v6, %v478_v11  ;;  %v512_v11 = vmul.f32 %v1717_v32, %v470_v35  ;;  %v3796_v32 = vld [vmem:[#allocation18_spill] sm:$0xff]  ;;  %v3799_v35 = vld [vmem:[#allocation5_spill] sm:$0xff] }
 0x11a   :  { %v480_v29 = vadd.f32 %v1715_v6, %v479_v41  ;;  %v3792_v41 = vld [vmem:[#allocation16_spill] sm:$0xff] }
 0x11c   :  { %v484_v4 = vsel %vm483_vm5, %v1715_v6, %v480_v29  ;;  %v2937_v29 = vld [vmem:[%s3646_s2] sm:$0xff] }
 0x11d   :  { %v489_v34 = vsel %vm486_vm7, %v488_v23, %v484_v4  ;;  %3795 = vst [vmem:[#allocation11_spill] sm:$0xff] %v2937_v29  ;;  %v3797_v23 = vld [vmem:[#allocation19_spill] sm:$0xff] }
 0x11e   :  { %v511_v53 = vmul.f32 0.0, %v489_v34  ;;  %v2820_v34 = vld [vmem:[%s3646_s2 + $0x1a0] sm:$0xff] }
 0x120   :  { %v2790_v19 = vadd.f32 %v512_v11, %v511_v53  ;;  %v2802_v53 = vld [vmem:[%s3646_s2 + $0x1e0] sm:$0xff] }
 0x122   :  { %1718 = vtanh.f32 %v2790_v19 }
 0x128   :  { %v1719_v6 = vpop.eup %1718 }
 0x129   :  { %v2793_v61 = vmul.f32 %v1719_v6, %v509_v48  ;;  %v3801_v48 = vld [vmem:[#allocation7_spill] sm:$0xff] }
 0x12b   :  { %3782 = vst [vmem:[#allocation43_spill] sm:$0xff] %v2793_v61  ;;  %537 = vmatmul.f32.vlgmr.msrb.gmra.mxu0 %v2793_v61  ;;  %557 = vmatmul.f32.vlgmr.msrb.gmra.mxu1 %v2793_v61 }
 0x12c   :  { %577 = vmatmul.f32.vlgmr.msrb.gmra.mxu2 %v2793_v61  ;;  %597 = vmatmul.f32.vlgmr.msra.gmra.mxu3 %v2793_v61 }
 0x12d   :  { %825 = vmatpush.msrb.mxu0 %v2802_v53  ;;  %845 = vmatpush.msrb.mxu1 %v2363_v54 }
 0x12e   :  { %865 = vmatpush.msrb.mxu2 %v2369_v56  ;;  %885 = vmatpush.msra.mxu3 %v2170_v55  ;;  %v2829_v55 = vld [vmem:[%s3646_s2 + $0x180] sm:$0xff] }
 0x12f   :  { %826 = vmatpush.msrb.mxu0 %v2811_v47  ;;  %846 = vmatpush.msrb.mxu1 %v2376_v58 }
 0x130   :  { %866 = vmatpush.msrb.mxu2 %v2388_v63  ;;  %886 = vmatpush.msra.mxu3 %v2183_v59  ;;  %v2838_v59 = vld [vmem:[%s3646_s2 + $0x160] sm:$0xff] }
 0x131   :  { %827 = vmatpush.msrb.mxu0 %v2820_v34  ;;  %847 = vmatpush.msrb.mxu1 %v2394_v0 }
 0x132   :  { %867 = vmatpush.msrb.mxu2 %v2406_v1  ;;  %887 = vmatpush.msra.mxu3 %v2214_v2  ;;  %v2847_v2 = vld [vmem:[%s3646_s2 + $0x140] sm:$0xff] }
 0x133   :  { %828 = vmatpush.msrb.mxu0 %v2829_v55  ;;  %848 = vmatpush.msrb.mxu1 %v2412_v3 }
 0x134   :  { %868 = vmatpush.msrb.mxu2 %v2426_v9  ;;  %888 = vmatpush.msra.mxu3 %v2227_v7  ;;  %v2856_v7 = vld [vmem:[%s3646_s2 + $0x120] sm:$0xff] }
 0x135   :  { %829 = vmatpush.msrb.mxu0 %v2838_v59  ;;  %849 = vmatpush.msrb.mxu1 %v2431_v10 }
 0x136   :  { %869 = vmatpush.msrb.mxu2 %v2440_v13  ;;  %889 = vmatpush.msra.mxu3 %v2239_v12  ;;  %v2865_v12 = vld [vmem:[%s3646_s2 + $0x100] sm:$0xff] }
 0x137   :  { %830 = vmatpush.msrb.mxu0 %v2847_v2  ;;  %850 = vmatpush.msrb.mxu1 %v2446_v18 }
 0x138   :  { %870 = vmatpush.msrb.mxu2 %v2459_v21  ;;  %890 = vmatpush.msra.mxu3 %v2271_v22  ;;  %v2874_v22 = vld [vmem:[%s3646_s2 + $0xe0] sm:$0xff] }
 0x139   :  { %831 = vmatpush.msrb.mxu0 %v2856_v7  ;;  %851 = vmatpush.msrb.mxu1 %v2465_v24 }
 0x13a   :  { %871 = vmatpush.msrb.mxu2 %v2478_v25  ;;  %891 = vmatpush.msra.mxu3 %v2284_v27  ;;  %v2883_v27 = vld [vmem:[%s3646_s2 + $0xc0] sm:$0xff] }
 0x13b   :  { %832 = vmatpush.msrb.mxu0 %v2865_v12  ;;  %852 = vmatpush.msrb.mxu1 %v2483_v28 }
 0x13c   :  { %872 = vmatpush.msrb.mxu2 %v2492_v30  ;;  %892 = vmatpush.msra.mxu3 %v2296_v31  ;;  %v2892_v31 = vld [vmem:[%s3646_s2 + $0xa0] sm:$0xff] }
 0x13d   :  { %833 = vmatpush.msrb.mxu0 %v2874_v22  ;;  %853 = vmatpush.msrb.mxu1 %v2497_v33  ;;  %3783 = vst [vmem:[#allocation44_spill] sm:$0xff] %v2892_v31 }
 0x13e   :  { %873 = vmatpush.msrb.mxu2 %v2505_v37  ;;  %893 = vmatpush.msra.mxu3 %v2328_v42  ;;  %v2901_v42 = vld [vmem:[%s3646_s2 + $0x80] sm:$0xff] }
 0x13f   :  { %834 = vmatpush.msrb.mxu0 %v2883_v27  ;;  %854 = vmatpush.msrb.mxu1 %v2512_v39  ;;  %3784 = vst [vmem:[#allocation45_spill] sm:$0xff] %v2901_v42 }
 0x140   :  { %874 = vmatpush.msrb.mxu2 %v2520_v40  ;;  %894 = vmatpush.msra.mxu3 %v2341_v46  ;;  %v2910_v46 = vld [vmem:[%s3646_s2 + $0x60] sm:$0xff] }
 0x141   :  { %835 = vmatpush.msrb.mxu0 %v2892_v31  ;;  %855 = vmatpush.msrb.mxu1 %v2526_v43  ;;  %3785 = vst [vmem:[#allocation46_spill] sm:$0xff] %v2910_v46 }
 0x142   :  { %875 = vmatpush.msrb.mxu2 %v2533_v15  ;;  %895 = vmatpush.msra.mxu3 %v2353_v52  ;;  %v3786_v52 = vld [vmem:[#allocation9_spill] sm:$0xff] }
 0x143   :  { %836 = vmatpush.msrb.mxu0 %v2901_v42  ;;  %856 = vmatpush.msrb.mxu1 %v2539_v45  ;;  %3787 = vst [vmem:[#allocation9_spill] sm:$0xff] %v2919_v26 }
 0x144   :  { %876 = vmatpush.msrb.mxu2 %v2547_v49  ;;  %896 = vmatpush.msra.mxu3 %v2381_v60  ;;  %v3788_v60 = vld [vmem:[#allocation13_spill] sm:$0xff] }
 0x145   :  { %837 = vmatpush.msrb.mxu0 %v2910_v46  ;;  %857 = vmatpush.msrb.mxu1 %v2553_v50 }
 0x146   :  { %877 = vmatpush.msrb.mxu2 %v2571_v57  ;;  %897 = vmatpush.msra.mxu3 %v3786_v52 }
 0x147   :  { %838 = vmatpush.msrb.mxu0 %v2919_v26  ;;  %858 = vmatpush.msrb.mxu1 %v3788_v60 }
 0x148   :  { %878 = vmatpush.msrb.mxu2 %v3789_v16  ;;  %898 = vmatpush.msra.mxu3 %v3790_v20 }
 0x149   :  { %839 = vmatpush.msrb.mxu0 %v2928_v44  ;;  %859 = vmatpush.msrb.mxu1 %v3792_v41 }
 0x14a   :  { %879 = vmatpush.msrb.mxu2 %v3793_v14  ;;  %899 = vmatpush.msra.mxu3 %v3794_v8 }
 0x14b   :  { %840 = vmatpush.msrb.mxu0 %v2937_v29  ;;  %860 = vmatpush.msrb.mxu1 %v3796_v32 }
 0x14c   :  { %880 = vmatpush.msrb.mxu2 %v3797_v23  ;;  %900 = vmatpush.msra.mxu3 %v3798_v36 }
 0x1a8   :  { %v538_v4 = vpop.f32.mrf.mxu0  ;;  %v558_v5 = vpop.f32.mrf.mxu1 }
 0x1a9   :  { %v601_v11 = vadd.f32 %v538_v4, %v3799_v35  ;;  %v602_v62 = vadd.f32 %v558_v5, %v3800_v38  ;;  %v3802_v5 = vld [vmem:[#allocation27_spill] sm:$0xff] }
 0x1ab   :  { %v1665_v17 = vmul.f32 -1.442695, %v601_v11  ;;  %v1666_v51 = vmul.f32 -1.442695, %v602_v62 }
 0x1ad   :  { %1720 = vpow2.f32 %v1665_v17 }
 0x1ae   :  { %1722 = vpow2.f32 %v1666_v51 }
 0x1af   :  { %v598_v6 = vpop.f32.mrf.mxu3  ;;  %v578_v36 = vpop.f32.mrf.mxu2 }
 0x1b0   :  { %v604_v52 = vadd.f32 %v598_v6, %v3801_v48  ;;  %v603_v11 = vadd.f32 %v578_v36, %v3802_v5 }
 0x1b2   :  { %v1667_v20 = vmul.f32 -1.442695, %v604_v52 }
 0x1b3   :  { %v1721_v8 = vpop.eup %1720 }
 0x1b4   :  { %v1723_v61 = vpop.eup %1722  ;;  %v608_v32 = vadd.f32 1.0, %v1721_v8  ;;  %1724 = vpow2.f32 %v1667_v20 }
 0x1b5   :  { %v627_v23 = vadd.f32 1.0, %v1723_v61 }
 0x1b6   :  { %1726 = vrcp.f32 %v608_v32  ;;  %v620_v48 = vand.u32 2147483648, %v608_v32  ;;  %v618_v61 = vand.u32 2147483647, %v608_v32  ;;  %vm614_vm14 = vweird.f32 %v608_v32 }
 0x1b7   :  { %1728 = vrcp.f32 %v627_v23  ;;  %v639_v52 = vand.u32 2147483648, %v627_v23  ;;  %v637_v14 = vand.u32 2147483647, %v627_v23  ;;  %vm633_vm15 = vweird.f32 %v627_v23 }
 0x1b8   :  { %v621_v36 = vor.u32 1.1754944e-38, %v620_v48  ;;  %vm619_vm2 = vcmp.eq.f32.partialorder %v618_v61, 8.507059e+37 }
 0x1b9   :  { %vm638_vm3 = vcmp.eq.f32.partialorder %v637_v14, 8.507059e+37 }
 0x1ba   :  { %v1725_v29 = vpop.eup %1724 }
 0x1bb   :  { %v647_v4 = vadd.f32 1.0, %v1725_v29 }
 0x1bc   :  { %v1727_v35 = vpop.eup %1726 }
 0x1bd   :  { %v1729_v38 = vpop.eup %1728  ;;  %v610_v62 = vmul.f32 %v1727_v35, %v608_v32  ;;  %1730 = vrcp.f32 %v647_v4  ;;  %vm615_vm12 = vweird.f32 %v1727_v35  ;;  %v659_v48 = vand.u32 2147483648, %v647_v4 }
 0x1be   :  { %v629_v17 = vmul.f32 %v1729_v38, %v627_v23  ;;  %1732 = vtanh.f32 %v603_v11  ;;  %vm634_vm13 = vweird.f32 %v1729_v38  ;;  %vm616_vm0 = vmor %vm614_vm14, %vm615_vm12  ;;  %vm653_vm5 = vweird.f32 %v647_v4 }
 0x1bf   :  { %v611_v51 = vsub.f32 1.0, %v610_v62  ;;  %vm635_vm1 = vmor %vm633_vm15, %vm634_vm13  ;;  %v640_v62 = vor.u32 1.1754944e-38, %v639_v52  ;;  %v660_v61 = vor.u32 1.1754944e-38, %v659_v48 }
 0x1c0   :  { %v630_v6 = vsub.f32 1.0, %v629_v17 }
 0x1c1   :  { %v612_v8 = vmul.f32 %v1727_v35, %v611_v51 }
 0x1c2   :  { %v631_v20 = vmul.f32 %v1729_v38, %v630_v6 }
 0x1c3   :  { %v1731_v41 = vpop.eup %1730  ;;  %v613_v29 = vadd.f32 %v1727_v35, %v612_v8 }
 0x1c4   :  { %v632_v5 = vadd.f32 %v1729_v38, %v631_v20  ;;  %v649_v44 = vmul.f32 %v1731_v41, %v647_v4  ;;  %v1733_v11 = vpop.eup %1732  ;;  %vm654_vm4 = vweird.f32 %v1731_v41 }
 0x1c5   :  { %v617_v17 = vsel %vm616_vm0, %v1727_v35, %v613_v29  ;;  %v657_v35 = vand.u32 2147483647, %v647_v4  ;;  %vm655_vm6 = vmor %vm653_vm5, %vm654_vm4 }
 0x1c6   :  { %v622_v16 = vsel %vm619_vm2, %v621_v36, %v617_v17  ;;  %v636_v51 = vsel %vm635_vm1, %v1729_v38, %v632_v5  ;;  %v650_v60 = vsub.f32 1.0, %v649_v44  ;;  %v3823_v5 = vld [vmem:[#allocation21_spill] sm:$0xff] }
 0x1c7   :  { %v641_v6 = vsel %vm638_vm3, %v640_v62, %v636_v51  ;;  %v664_v26 = vmul.f32 %v1733_v11, %v622_v16  ;;  %vm658_vm7 = vcmp.eq.f32.partialorder %v657_v35, 8.507059e+37 }
 0x1c8   :  { %v663_v57 = vmul.f32 %v641_v6, %v2790_v19  ;;  %v651_v8 = vmul.f32 %v1731_v41, %v650_v60  ;;  %v2972_v19 = vld [vmem:[%s3646_s2 + $0x1d8] sm:$0xff]  ;;  %v3821_v60 = vld [vmem:[#allocation8_spill] sm:$0xff] }
 0x1ca   :  { %v2948_v32 = vadd.f32 %v664_v26, %v663_v57  ;;  %v652_v23 = vadd.f32 %v1731_v41, %v651_v8  ;;  %v2963_v57 = vld [vmem:[%s3646_s2 + $0x1f8] sm:$0xff] }
 0x1cc   :  { %1734 = vtanh.f32 %v2948_v32  ;;  %v656_v52 = vsel %vm655_vm6, %v1731_v41, %v652_v23  ;;  %v3822_v41 = vld [vmem:[#allocation29_spill] sm:$0xff] }
 0x1cd   :  { %v661_v44 = vsel %vm658_vm7, %v660_v61, %v656_v52  ;;  %v3824_v61 = vld [vmem:[#allocation30_spill] sm:$0xff] }
 0x1d2   :  { %v1735_v14 = vpop.eup %1734 }
 0x1d3   :  { %v2951_v38 = vmul.f32 %v1735_v14, %v661_v44 }
 0x1d5   :  { %3803 = vst [vmem:[#allocation12_spill] sm:$0xff] %v2951_v38  ;;  %689 = vmatmul.f32.vlgmr.msra.gmra.mxu0 %v2951_v38  ;;  %709 = vmatmul.f32.vlgmr.msra.gmra.mxu1 %v2951_v38 }
 0x1d6   :  { %729 = vmatmul.f32.vlgmr.msra.gmra.mxu2 %v2951_v38  ;;  %749 = vmatmul.f32.vlgmr.msrb.gmra.mxu3 %v2951_v38  ;;  %v3329_v38 = vld [vmem:[%s3646_s2 + $0x8] sm:$0xff] }
 0x1d7   :  { %977 = vmatpush.msra.mxu0 %v2802_v53  ;;  %997 = vmatpush.msra.mxu1 %v2363_v54  ;;  %v2981_v54 = vld [vmem:[%s3646_s2 + $0x1b8] sm:$0xff]  ;;  %3837 = vst [vmem:[#allocation51_spill] sm:$0xff] %v3329_v38 }
 0x1d8   :  { %1017 = vmatpush.msra.mxu2 %v2369_v56  ;;  %1037 = vmatpush.msrb.mxu3 %v2963_v57  ;;  %v2990_v56 = vld [vmem:[%s3646_s2 + $0x198] sm:$0xff] }
 0x1d9   :  { %978 = vmatpush.msra.mxu0 %v2811_v47  ;;  %998 = vmatpush.msra.mxu1 %v2376_v58  ;;  %v2999_v58 = vld [vmem:[%s3646_s2 + $0x178] sm:$0xff] }
 0x1da   :  { %1018 = vmatpush.msra.mxu2 %v2388_v63  ;;  %1038 = vmatpush.msrb.mxu3 %v2972_v19  ;;  %v3008_v63 = vld [vmem:[%s3646_s2 + $0x158] sm:$0xff] }
 0x1db   :  { %979 = vmatpush.msra.mxu0 %v2820_v34  ;;  %999 = vmatpush.msra.mxu1 %v2394_v0  ;;  %v3017_v0 = vld [vmem:[%s3646_s2 + $0x138] sm:$0xff] }
 0x1dc   :  { %1019 = vmatpush.msra.mxu2 %v2406_v1  ;;  %1039 = vmatpush.msrb.mxu3 %v2981_v54  ;;  %v3026_v1 = vld [vmem:[%s3646_s2 + $0x118] sm:$0xff] }
 0x1dd   :  { %980 = vmatpush.msra.mxu0 %v2829_v55  ;;  %1000 = vmatpush.msra.mxu1 %v2412_v3  ;;  %v3035_v3 = vld [vmem:[%s3646_s2 + $0xf8] sm:$0xff] }
 0x1de   :  { %1020 = vmatpush.msra.mxu2 %v2426_v9  ;;  %1040 = vmatpush.msrb.mxu3 %v2990_v56  ;;  %v3044_v9 = vld [vmem:[%s3646_s2 + $0xd8] sm:$0xff] }
 0x1df   :  { %981 = vmatpush.msra.mxu0 %v2838_v59  ;;  %1001 = vmatpush.msra.mxu1 %v2431_v10  ;;  %3804 = vst [vmem:[#allocation5_spill] sm:$0xff] %v3044_v9  ;;  %v3053_v10 = vld [vmem:[%s3646_s2 + $0xb8] sm:$0xff] }
 0x1e0   :  { %1021 = vmatpush.msra.mxu2 %v2440_v13  ;;  %1041 = vmatpush.msrb.mxu3 %v2999_v58  ;;  %3805 = vst [vmem:[#allocation26_spill] sm:$0xff] %v3053_v10  ;;  %v3062_v13 = vld [vmem:[%s3646_s2 + $0x98] sm:$0xff] }
 0x1e1   :  { %982 = vmatpush.msra.mxu0 %v2847_v2  ;;  %1002 = vmatpush.msra.mxu1 %v2446_v18  ;;  %3806 = vst [vmem:[#allocation7_spill] sm:$0xff] %v3062_v13  ;;  %v3807_v18 = vld [vmem:[#allocation14_spill] sm:$0xff] }
 0x1e2   :  { %1022 = vmatpush.msra.mxu2 %v2459_v21  ;;  %1042 = vmatpush.msrb.mxu3 %v3008_v63  ;;  %v3071_v21 = vld [vmem:[%s3646_s2 + $0x78] sm:$0xff] }
 0x1e3   :  { %983 = vmatpush.msra.mxu0 %v2856_v7  ;;  %1003 = vmatpush.msra.mxu1 %v2465_v24  ;;  %3808 = vst [vmem:[#allocation27_spill] sm:$0xff] %v3071_v21  ;;  %v3809_v24 = vld [vmem:[#allocation9_spill] sm:$0xff] }
 0x1e4   :  { %1023 = vmatpush.msra.mxu2 %v2478_v25  ;;  %1043 = vmatpush.msrb.mxu3 %v3017_v0  ;;  %v3810_v25 = vld [vmem:[#allocation13_spill] sm:$0xff] }
 0x1e5   :  { %984 = vmatpush.msra.mxu0 %v2865_v12  ;;  %1004 = vmatpush.msra.mxu1 %v2483_v28  ;;  %v3811_v28 = vld [vmem:[#allocation15_spill] sm:$0xff] }
 0x1e6   :  { %1024 = vmatpush.msra.mxu2 %v2492_v30  ;;  %1044 = vmatpush.msrb.mxu3 %v3026_v1  ;;  %v3080_v30 = vld [vmem:[%s3646_s2 + $0x58] sm:$0xff] }
 0x1e7   :  { %985 = vmatpush.msra.mxu0 %v2874_v22  ;;  %1005 = vmatpush.msra.mxu1 %v2497_v33  ;;  %3812 = vst [vmem:[#allocation14_spill] sm:$0xff] %v3080_v30  ;;  %v3813_v33 = vld [vmem:[#allocation10_spill] sm:$0xff] }
 0x1e8   :  { %1025 = vmatpush.msra.mxu2 %v2505_v37  ;;  %1045 = vmatpush.msrb.mxu3 %v3035_v3  ;;  %v3814_v37 = vld [vmem:[#allocation16_spill] sm:$0xff] }
 0x1e9   :  { %986 = vmatpush.msra.mxu0 %v2883_v27  ;;  %1006 = vmatpush.msra.mxu1 %v2512_v39  ;;  %v3815_v39 = vld [vmem:[#allocation17_spill] sm:$0xff] }
 0x1ea   :  { %1026 = vmatpush.msra.mxu2 %v2520_v40  ;;  %1046 = vmatpush.msrb.mxu3 %v3044_v9  ;;  %v3089_v40 = vld [vmem:[%s3646_s2 + $0x38] sm:$0xff] }
 0x1eb   :  { %987 = vmatpush.msra.mxu0 %v2892_v31  ;;  %1007 = vmatpush.msra.mxu1 %v2526_v43  ;;  %3816 = vst [vmem:[#allocation13_spill] sm:$0xff] %v3089_v40  ;;  %v3817_v43 = vld [vmem:[#allocation11_spill] sm:$0xff] }
 0x1ec   :  { %1027 = vmatpush.msra.mxu2 %v2533_v15  ;;  %1047 = vmatpush.msrb.mxu3 %v3053_v10  ;;  %v3818_v15 = vld [vmem:[#allocation18_spill] sm:$0xff] }
 0x1ed   :  { %988 = vmatpush.msra.mxu0 %v2901_v42  ;;  %1008 = vmatpush.msra.mxu1 %v2539_v45  ;;  %v3819_v45 = vld [vmem:[#allocation19_spill] sm:$0xff] }
 0x1ee   :  { %1028 = vmatpush.msra.mxu2 %v2547_v49  ;;  %1048 = vmatpush.msrb.mxu3 %v3062_v13  ;;  %v3098_v49 = vld [vmem:[%s3646_s2 + $0x18] sm:$0xff] }
 0x1ef   :  { %989 = vmatpush.msra.mxu0 %v2910_v46  ;;  %1009 = vmatpush.msra.mxu1 %v2553_v50  ;;  %3820 = vst [vmem:[#allocation15_spill] sm:$0xff] %v3098_v49 }
 0x1f0   :  { %1029 = vmatpush.msra.mxu2 %v3807_v18  ;;  %1049 = vmatpush.msrb.mxu3 %v3071_v21 }
 0x1f1   :  { %990 = vmatpush.msra.mxu0 %v3809_v24  ;;  %1010 = vmatpush.msra.mxu1 %v3810_v25 }
 0x1f2   :  { %1030 = vmatpush.msra.mxu2 %v3811_v28  ;;  %1050 = vmatpush.msrb.mxu3 %v3080_v30 }
 0x1f3   :  { %991 = vmatpush.msra.mxu0 %v3813_v33  ;;  %1011 = vmatpush.msra.mxu1 %v3814_v37 }
 0x1f4   :  { %1031 = vmatpush.msra.mxu2 %v3815_v39  ;;  %1051 = vmatpush.msrb.mxu3 %v3089_v40 }
 0x1f5   :  { %992 = vmatpush.msra.mxu0 %v3817_v43  ;;  %1012 = vmatpush.msra.mxu1 %v3818_v15 }
 0x1f6   :  { %1032 = vmatpush.msra.mxu2 %v3819_v45  ;;  %1052 = vmatpush.msrb.mxu3 %v3098_v49 }
 0x252   :  { %v690_v50 = vpop.f32.mrf.mxu0  ;;  %v710_v26 = vpop.f32.mrf.mxu1 }
 0x253   :  { %v753_v16 = vadd.f32 %v690_v50, %v3821_v60  ;;  %v754_v4 = vadd.f32 %v710_v26, %v3822_v41 }
 0x255   :  { %v1668_v20 = vmul.f32 -1.442695, %v753_v16  ;;  %v1669_v29 = vmul.f32 -1.442695, %v754_v4 }
 0x257   :  { %1736 = vpow2.f32 %v1668_v20 }
 0x258   :  { %1738 = vpow2.f32 %v1669_v29 }
 0x259   :  { %v750_v36 = vpop.f32.mrf.mxu3  ;;  %v730_v23 = vpop.f32.mrf.mxu2 }
 0x25a   :  { %v756_v62 = vadd.f32 %v750_v36, %v3823_v5  ;;  %v755_v14 = vadd.f32 %v730_v23, %v3824_v61 }
 0x25c   :  { %v1670_v17 = vmul.f32 -1.442695, %v756_v62 }
 0x25d   :  { %v1737_v11 = vpop.eup %1736 }
 0x25e   :  { %v1739_v51 = vpop.eup %1738  ;;  %v760_v6 = vadd.f32 1.0, %v1737_v11  ;;  %1740 = vpow2.f32 %v1670_v17 }
 0x25f   :  { %v779_v8 = vadd.f32 1.0, %v1739_v51 }
 0x260   :  { %1742 = vrcp.f32 %v760_v6  ;;  %v772_v39 = vand.u32 2147483648, %v760_v6  ;;  %v770_v50 = vand.u32 2147483647, %v760_v6  ;;  %vm766_vm10 = vweird.f32 %v760_v6 }
 0x261   :  { %1744 = vrcp.f32 %v779_v8  ;;  %v791_v15 = vand.u32 2147483648, %v779_v8  ;;  %v789_v60 = vand.u32 2147483647, %v779_v8  ;;  %vm785_vm11 = vweird.f32 %v779_v8 }
 0x262   :  { %v773_v4 = vor.u32 1.1754944e-38, %v772_v39  ;;  %vm771_vm14 = vcmp.eq.f32.partialorder %v770_v50, 8.507059e+37  ;;  %v3147_v50 = vld [vmem:[%s3646_s2 + $0x1a8] sm:$0xff] }
 0x263   :  { %v792_v36 = vor.u32 1.1754944e-38, %v791_v15  ;;  %vm790_vm15 = vcmp.eq.f32.partialorder %v789_v60, 8.507059e+37  ;;  %v3133_v15 = vld [vmem:[%s3646_s2 + $0x1c8] sm:$0xff] }
 0x264   :  { %v1741_v48 = vpop.eup %1740  ;;  %v3161_v60 = vld [vmem:[%s3646_s2 + $0x188] sm:$0xff] }
 0x265   :  { %v799_v35 = vadd.f32 1.0, %v1741_v48 }
 0x266   :  { %v1743_v52 = vpop.eup %1742 }
 0x267   :  { %v1745_v44 = vpop.eup %1744  ;;  %v762_v18 = vmul.f32 %v1743_v52, %v760_v6  ;;  %1746 = vrcp.f32 %v799_v35  ;;  %vm767_vm8 = vweird.f32 %v1743_v52  ;;  %vm805_vm1 = vweird.f32 %v799_v35 }
 0x268   :  { %v781_v25 = vmul.f32 %v1745_v44, %v779_v8  ;;  %1748 = vtanh.f32 %v755_v14  ;;  %vm786_vm9 = vweird.f32 %v1745_v44  ;;  %vm768_vm12 = vmor %vm766_vm10, %vm767_vm8 }
 0x269   :  { %v763_v28 = vsub.f32 1.0, %v762_v18  ;;  %vm787_vm13 = vmor %vm785_vm11, %vm786_vm9  ;;  %v811_v18 = vand.u32 2147483648, %v799_v35 }
 0x26a   :  { %v782_v37 = vsub.f32 1.0, %v781_v25 }
 0x26b   :  { %v764_v45 = vmul.f32 %v1743_v52, %v763_v28  ;;  %v812_v28 = vor.u32 1.1754944e-38, %v811_v18  ;;  %v3279_v18 = vld [vmem:[%s3646_s2 + $0x90] sm:$0xff] }
 0x26c   :  { %v783_v26 = vmul.f32 %v1745_v44, %v782_v37  ;;  %3830 = vst [vmem:[#allocation29_spill] sm:$0xff] %v3279_v18 }
 0x26d   :  { %v1747_v16 = vpop.eup %1746  ;;  %v765_v41 = vadd.f32 %v1743_v52, %v764_v45  ;;  %v3139_v45 = vld [vmem:[%s3646_s2 + $0x1d0] sm:$0xff] }
 0x26e   :  { %v784_v20 = vadd.f32 %v1745_v44, %v783_v26  ;;  %v801_v29 = vmul.f32 %v1747_v16, %v799_v35  ;;  %v1749_v62 = vpop.eup %1748  ;;  %vm806_vm0 = vweird.f32 %v1747_v16  ;;  %v3153_v26 = vld [vmem:[%s3646_s2 + $0x1b0] sm:$0xff] }
 0x26f   :  { %v769_v5 = vsel %vm768_vm12, %v1743_v52, %v765_v41  ;;  %v809_v52 = vand.u32 2147483647, %v799_v35  ;;  %vm807_vm2 = vmor %vm805_vm1, %vm806_vm0  ;;  %v3125_v35 = vld [vmem:[%s3646_s2 + $0x1f0] sm:$0xff]  ;;  %v3175_v41 = vld [vmem:[%s3646_s2 + $0x168] sm:$0xff] }
 0x270   :  { %v774_v17 = vsel %vm771_vm14, %v773_v4, %v769_v5  ;;  %v788_v11 = vsel %vm787_vm13, %v1745_v44, %v784_v20  ;;  %v802_v51 = vsub.f32 1.0, %v801_v29  ;;  %v3181_v4 = vld [vmem:[%s3646_s2 + $0x170] sm:$0xff]  ;;  %v3189_v20 = vld [vmem:[%s3646_s2 + $0x148] sm:$0xff] }
 0x271   :  { %v793_v23 = vsel %vm790_vm15, %v792_v36, %v788_v11  ;;  %v816_v48 = vmul.f32 %v1749_v62, %v774_v17  ;;  %vm810_vm3 = vcmp.eq.f32.partialorder %v809_v52, 8.507059e+37  ;;  %v3195_v29 = vld [vmem:[%s3646_s2 + $0x150] sm:$0xff]  ;;  %v3203_v36 = vld [vmem:[%s3646_s2 + $0x128] sm:$0xff] }
 0x272   :  { %v815_v61 = vmul.f32 %v793_v23, %v2948_v32  ;;  %v803_v14 = vmul.f32 %v1747_v16, %v802_v51  ;;  %v3119_v32 = vld [vmem:[%s3646_s2 + $0x1e8] sm:$0xff]  ;;  %v3209_v5 = vld [vmem:[%s3646_s2 + $0x130] sm:$0xff] }
 0x273   :  { %v3217_v62 = vld [vmem:[%s3646_s2 + $0x108] sm:$0xff]  ;;  %v3223_v17 = vld [vmem:[%s3646_s2 + $0x110] sm:$0xff] }
 0x274   :  { %v3106_v6 = vadd.f32 %v816_v48, %v815_v61  ;;  %v804_v8 = vadd.f32 %v1747_v16, %v803_v14  ;;  %v3231_v11 = vld [vmem:[%s3646_s2 + $0xe8] sm:$0xff]  ;;  %v3237_v51 = vld [vmem:[%s3646_s2 + $0xf0] sm:$0xff] }
 0x275   :  { %v3245_v23 = vld [vmem:[%s3646_s2 + $0xc8] sm:$0xff]  ;;  %v3251_v48 = vld [vmem:[%s3646_s2 + $0xd0] sm:$0xff] }
 0x276   :  { %1750 = vtanh.f32 %v3106_v6  ;;  %v808_v25 = vsel %vm807_vm2, %v1747_v16, %v804_v8  ;;  %v3167_v16 = vld [vmem:[%s3646_s2 + $0x190] sm:$0xff]  ;;  %3826 = vst [vmem:[#allocation17_spill] sm:$0xff] %v3251_v48  ;;  %v3259_v61 = vld [vmem:[%s3646_s2 + $0xa8] sm:$0xff] }
 0x277   :  { %v813_v37 = vsel %vm810_vm3, %v812_v28, %v808_v25  ;;  %3827 = vst [vmem:[#allocation18_spill] sm:$0xff] %v3259_v61  ;;  %v3265_v14 = vld [vmem:[%s3646_s2 + $0xb0] sm:$0xff]  ;;  %v3273_v8 = vld [vmem:[%s3646_s2 + $0x88] sm:$0xff] }
 0x278   :  { %3828 = vst [vmem:[#allocation19_spill] sm:$0xff] %v3265_v14  ;;  %v3287_v52 = vld [vmem:[%s3646_s2 + $0x68] sm:$0xff]  ;;  %v3293_v25 = vld [vmem:[%s3646_s2 + $0x70] sm:$0xff] }
 0x279   :  { %3829 = vst [vmem:[#allocation8_spill] sm:$0xff] %v3273_v8  ;;  %v3301_v28 = vld [vmem:[%s3646_s2 + $0x48] sm:$0xff] }
 0x27a   :  { %3831 = vst [vmem:[#allocation21_spill] sm:$0xff] %v3287_v52 }
 0x27b   :  { %3832 = vst [vmem:[#allocation30_spill] sm:$0xff] %v3293_v25 }
 0x27c   :  { %v1751_v44 = vpop.eup %1750  ;;  %3833 = vst [vmem:[#allocation47_spill] sm:$0xff] %v3301_v28 }
 0x27d   :  { %v3109_v39 = vmul.f32 %v1751_v44, %v813_v37  ;;  %v3307_v44 = vld [vmem:[%s3646_s2 + $0x50] sm:$0xff]  ;;  %v3315_v37 = vld [vmem:[%s3646_s2 + $0x28] sm:$0xff] }
 0x27e   :  { %3834 = vst [vmem:[#allocation48_spill] sm:$0xff] %v3307_v44 }
 0x27f   :  { %3825 = vst [vmem:[#allocation16_spill] sm:$0xff] %v3109_v39  ;;  %841 = vmatmul.f32.vlgmr.msrb.gmra.mxu0 %v3109_v39  ;;  %861 = vmatmul.f32.vlgmr.msrb.gmra.mxu1 %v3109_v39 }
 0x280   :  { %881 = vmatmul.f32.vlgmr.msrb.gmra.mxu2 %v3109_v39  ;;  %901 = vmatmul.f32.vlgmr.msra.gmra.mxu3 %v3109_v39  ;;  %3835 = vst [vmem:[#allocation49_spill] sm:$0xff] %v3315_v37  ;;  %v3321_v39 = vld [vmem:[%s3646_s2 + $0x30] sm:$0xff] }
 0x281   :  { %1129 = vmatpush.msrb.mxu0 %v2802_v53  ;;  %1149 = vmatpush.msrb.mxu1 %v3119_v32  ;;  %3836 = vst [vmem:[#allocation50_spill] sm:$0xff] %v3321_v39 }
 0x282   :  { %1169 = vmatpush.msrb.mxu2 %v3125_v35  ;;  %1189 = vmatpush.msra.mxu3 %v2963_v57 }
 0x283   :  { %1130 = vmatpush.msrb.mxu0 %v2811_v47  ;;  %1150 = vmatpush.msrb.mxu1 %v3133_v15 }
 0x284   :  { %1170 = vmatpush.msrb.mxu2 %v3139_v45  ;;  %1190 = vmatpush.msra.mxu3 %v2972_v19 }
 0x285   :  { %1131 = vmatpush.msrb.mxu0 %v2820_v34  ;;  %1151 = vmatpush.msrb.mxu1 %v3147_v50 }
 0x286   :  { %1171 = vmatpush.msrb.mxu2 %v3153_v26  ;;  %1191 = vmatpush.msra.mxu3 %v2981_v54 }
 0x287   :  { %1132 = vmatpush.msrb.mxu0 %v2829_v55  ;;  %1152 = vmatpush.msrb.mxu1 %v3161_v60 }
 0x288   :  { %1172 = vmatpush.msrb.mxu2 %v3167_v16  ;;  %1192 = vmatpush.msra.mxu3 %v2990_v56 }
 0x289   :  { %1133 = vmatpush.msrb.mxu0 %v2838_v59  ;;  %1153 = vmatpush.msrb.mxu1 %v3175_v41 }
 0x28a   :  { %1173 = vmatpush.msrb.mxu2 %v3181_v4  ;;  %1193 = vmatpush.msra.mxu3 %v2999_v58 }
 0x28b   :  { %1134 = vmatpush.msrb.mxu0 %v2847_v2  ;;  %1154 = vmatpush.msrb.mxu1 %v3189_v20 }
 0x28c   :  { %1174 = vmatpush.msrb.mxu2 %v3195_v29  ;;  %1194 = vmatpush.msra.mxu3 %v3008_v63 }
 0x28d   :  { %1135 = vmatpush.msrb.mxu0 %v2856_v7  ;;  %1155 = vmatpush.msrb.mxu1 %v3203_v36 }
 0x28e   :  { %1175 = vmatpush.msrb.mxu2 %v3209_v5  ;;  %1195 = vmatpush.msra.mxu3 %v3017_v0 }
 0x28f   :  { %1136 = vmatpush.msrb.mxu0 %v2865_v12  ;;  %1156 = vmatpush.msrb.mxu1 %v3217_v62 }
 0x290   :  { %1176 = vmatpush.msrb.mxu2 %v3223_v17  ;;  %1196 = vmatpush.msra.mxu3 %v3026_v1 }
 0x291   :  { %1137 = vmatpush.msrb.mxu0 %v2874_v22  ;;  %1157 = vmatpush.msrb.mxu1 %v3231_v11 }
 0x292   :  { %1177 = vmatpush.msrb.mxu2 %v3237_v51  ;;  %1197 = vmatpush.msra.mxu3 %v3035_v3 }
 0x293   :  { %1138 = vmatpush.msrb.mxu0 %v2883_v27  ;;  %1158 = vmatpush.msrb.mxu1 %v3245_v23 }
 0x294   :  { %1178 = vmatpush.msrb.mxu2 %v3251_v48  ;;  %1198 = vmatpush.msra.mxu3 %v3044_v9 }
 0x295   :  { %1139 = vmatpush.msrb.mxu0 %v2892_v31  ;;  %1159 = vmatpush.msrb.mxu1 %v3259_v61 }
 0x296   :  { %1179 = vmatpush.msrb.mxu2 %v3265_v14  ;;  %1199 = vmatpush.msra.mxu3 %v3053_v10 }
 0x297   :  { %1140 = vmatpush.msrb.mxu0 %v2901_v42  ;;  %1160 = vmatpush.msrb.mxu1 %v3273_v8 }
 0x298   :  { %1180 = vmatpush.msrb.mxu2 %v3279_v18  ;;  %1200 = vmatpush.msra.mxu3 %v3062_v13 }
 0x299   :  { %1141 = vmatpush.msrb.mxu0 %v2910_v46  ;;  %1161 = vmatpush.msrb.mxu1 %v3287_v52 }
 0x29a   :  { %1181 = vmatpush.msrb.mxu2 %v3293_v25  ;;  %1201 = vmatpush.msra.mxu3 %v3071_v21  ;;  %v3841_v21 = vld [vmem:[#allocation24_spill] sm:$0xff] }
 0x29b   :  { %1142 = vmatpush.msrb.mxu0 %v3809_v24  ;;  %1162 = vmatpush.msrb.mxu1 %v3301_v28 }
 0x29c   :  { %1182 = vmatpush.msrb.mxu2 %v3307_v44  ;;  %1202 = vmatpush.msra.mxu3 %v3080_v30  ;;  %v3840_v30 = vld [vmem:[#allocation32_spill] sm:$0xff] }
 0x29d   :  { %1143 = vmatpush.msrb.mxu0 %v3813_v33  ;;  %1163 = vmatpush.msrb.mxu1 %v3315_v37  ;;  %v3335_v37 = vld [vmem:[%s3646_s2 + $0x10] sm:$0xff] }
 0x29e   :  { %1183 = vmatpush.msrb.mxu2 %v3321_v39  ;;  %1203 = vmatpush.msra.mxu3 %v3089_v40  ;;  %3838 = vst [vmem:[#allocation52_spill] sm:$0xff] %v3335_v37  ;;  %v3839_v33 = vld [vmem:[#allocation22_spill] sm:$0xff] }
 0x29f   :  { %1144 = vmatpush.msrb.mxu0 %v3817_v43  ;;  %1164 = vmatpush.msrb.mxu1 %v3329_v38 }
 0x2a0   :  { %1184 = vmatpush.msrb.mxu2 %v3335_v37  ;;  %1204 = vmatpush.msra.mxu3 %v3098_v49 }
 0x2fc   :  { %v842_v39 = vpop.f32.mrf.mxu0  ;;  %v862_v40 = vpop.f32.mrf.mxu1 }
 0x2fd   :  { %v905_v43 = vadd.f32 %v842_v39, %v3839_v33  ;;  %v906_v44 = vadd.f32 %v862_v40, %v3840_v30  ;;  %v3842_v30 = vld [vmem:[#allocation33_spill] sm:$0xff] }
 0x2ff   :  { %v1671_v28 = vmul.f32 -1.442695, %v905_v43  ;;  %v1672_v24 = vmul.f32 -1.442695, %v906_v44 }
 0x301   :  { %1752 = vpow2.f32 %v1671_v28 }
 0x302   :  { %1754 = vpow2.f32 %v1672_v24 }
 0x303   :  { %v902_v38 = vpop.f32.mrf.mxu3  ;;  %v882_v49 = vpop.f32.mrf.mxu2 }
 0x304   :  { %v908_v25 = vadd.f32 %v902_v38, %v3841_v21  ;;  %v907_v40 = vadd.f32 %v882_v49, %v3842_v30 }
 0x306   :  { %v1673_v52 = vmul.f32 -1.442695, %v908_v25 }
 0x307   :  { %v1753_v46 = vpop.eup %1752 }
 0x308   :  { %v1755_v13 = vpop.eup %1754  ;;  %v912_v18 = vadd.f32 1.0, %v1753_v46  ;;  %1756 = vpow2.f32 %v1673_v52 }
 0x309   :  { %v931_v37 = vadd.f32 1.0, %v1755_v13 }
 0x30a   :  { %1758 = vrcp.f32 %v912_v18  ;;  %v924_v21 = vand.u32 2147483648, %v912_v18  ;;  %v922_v13 = vand.u32 2147483647, %v912_v18  ;;  %vm918_vm6 = vweird.f32 %v912_v18 }
 0x30b   :  { %1760 = vrcp.f32 %v931_v37  ;;  %v943_v25 = vand.u32 2147483648, %v931_v37  ;;  %v941_v42 = vand.u32 2147483647, %v931_v37  ;;  %vm937_vm7 = vweird.f32 %v931_v37 }
 0x30c   :  { %v925_v49 = vor.u32 1.1754944e-38, %v924_v21  ;;  %vm923_vm10 = vcmp.eq.f32.partialorder %v922_v13, 8.507059e+37 }
 0x30d   :  { %vm942_vm11 = vcmp.eq.f32.partialorder %v941_v42, 8.507059e+37 }
 0x30e   :  { %v1757_v8 = vpop.eup %1756 }
 0x30f   :  { %v951_v33 = vadd.f32 1.0, %v1757_v8 }
 0x310   :  { %v1759_v39 = vpop.eup %1758 }
 0x311   :  { %v1761_v43 = vpop.eup %1760  ;;  %v914_v28 = vmul.f32 %v1759_v39, %v912_v18  ;;  %1762 = vrcp.f32 %v951_v33  ;;  %vm919_vm4 = vweird.f32 %v1759_v39  ;;  %v963_v21 = vand.u32 2147483648, %v951_v33 }
 0x312   :  { %v933_v24 = vmul.f32 %v1761_v43, %v931_v37  ;;  %1764 = vtanh.f32 %v907_v40  ;;  %vm938_vm5 = vweird.f32 %v1761_v43  ;;  %vm920_vm8 = vmor %vm918_vm6, %vm919_vm4  ;;  %vm957_vm13 = vweird.f32 %v951_v33 }
 0x313   :  { %v915_v44 = vsub.f32 1.0, %v914_v28  ;;  %vm939_vm9 = vmor %vm937_vm7, %vm938_vm5  ;;  %v944_v28 = vor.u32 1.1754944e-38, %v943_v25  ;;  %v964_v13 = vor.u32 1.1754944e-38, %v963_v21  ;;  %v3870_v21 = vld [vmem:[#allocation4_spill] sm:$0xff] }
 0x314   :  { %v934_v38 = vsub.f32 1.0, %v933_v24 }
 0x315   :  { %v916_v46 = vmul.f32 %v1759_v39, %v915_v44 }
 0x316   :  { %v935_v52 = vmul.f32 %v1761_v43, %v934_v38 }
 0x317   :  { %v1763_v10 = vpop.eup %1762  ;;  %v917_v8 = vadd.f32 %v1759_v39, %v916_v46 }
 0x318   :  { %v936_v30 = vadd.f32 %v1761_v43, %v935_v52  ;;  %v953_v14 = vmul.f32 %v1763_v10, %v951_v33  ;;  %v1765_v40 = vpop.eup %1764  ;;  %vm958_vm12 = vweird.f32 %v1763_v10  ;;  %v3861_v52 = vld [vmem:[#allocation14_spill] sm:$0xff] }
 0x319   :  { %v921_v24 = vsel %vm920_vm8, %v1759_v39, %v917_v8  ;;  %v961_v39 = vand.u32 2147483647, %v951_v33  ;;  %vm959_vm14 = vmor %vm957_vm13, %vm958_vm12  ;;  %v3860_v33 = vld [vmem:[#allocation48_spill] sm:$0xff]  ;;  %v3862_v8 = vld [vmem:[#allocation10_spill] sm:$0xff] }
 0x31a   :  { %v926_v61 = vsel %vm923_vm10, %v925_v49, %v921_v24  ;;  %v940_v44 = vsel %vm939_vm9, %v1761_v43, %v936_v30  ;;  %v954_v31 = vsub.f32 1.0, %v953_v14  ;;  %v3863_v49 = vld [vmem:[#allocation49_spill] sm:$0xff]  ;;  %v3864_v30 = vld [vmem:[#allocation50_spill] sm:$0xff]  ;;  %v3866_v24 = vld [vmem:[#allocation11_spill] sm:$0xff] }
 0x31b   :  { %v945_v38 = vsel %vm942_vm11, %v944_v28, %v940_v44  ;;  %v968_v9 = vmul.f32 %v1765_v40, %v926_v61  ;;  %vm962_vm15 = vcmp.eq.f32.partialorder %v961_v39, 8.507059e+37  ;;  %v3859_v61 = vld [vmem:[#allocation47_spill] sm:$0xff]  ;;  %v3865_v28 = vld [vmem:[#allocation13_spill] sm:$0xff]  ;;  %v3868_v44 = vld [vmem:[#allocation52_spill] sm:$0xff] }
 0x31c   :  { %v967_v48 = vmul.f32 %v945_v38, %v3106_v6  ;;  %v955_v46 = vmul.f32 %v1763_v10, %v954_v31  ;;  %v3854_v31 = vld [vmem:[#allocation46_spill] sm:$0xff]  ;;  %v3857_v6 = vld [vmem:[#allocation27_spill] sm:$0xff] }
 0x31d   :  { %v3867_v40 = vld [vmem:[#allocation51_spill] sm:$0xff] }
 0x31e   :  { %v3344_v18 = vadd.f32 %v968_v9, %v967_v48  ;;  %v956_v37 = vadd.f32 %v1763_v10, %v955_v46  ;;  %v3855_v9 = vld [vmem:[#allocation21_spill] sm:$0xff]  ;;  %v3869_v38 = vld [vmem:[#allocation15_spill] sm:$0xff] }
 0x31f   :  { %v3858_v48 = vld [vmem:[#allocation9_spill] sm:$0xff] }
 0x320   :  { %1766 = vtanh.f32 %v3344_v18  ;;  %v960_v25 = vsel %vm959_vm14, %v1763_v10, %v956_v37  ;;  %v3856_v10 = vld [vmem:[#allocation30_spill] sm:$0xff] }
 0x321   :  { %v965_v14 = vsel %vm962_vm15, %v964_v13, %v960_v25  ;;  %v3871_v25 = vld [vmem:[#allocation35_spill] sm:$0xff] }
 0x326   :  { %v1767_v42 = vpop.eup %1766 }
 0x327   :  { %v3347_v43 = vmul.f32 %v1767_v42, %v965_v14 }
 0x329   :  { %3843 = vst [vmem:[#allocation22_spill] sm:$0xff] %v3347_v43  ;;  %993 = vmatmul.f32.vlgmr.msra.gmra.mxu0 %v3347_v43  ;;  %1013 = vmatmul.f32.vlgmr.msra.gmra.mxu1 %v3347_v43 }
 0x32a   :  { %1033 = vmatmul.f32.vlgmr.msra.gmra.mxu2 %v3347_v43  ;;  %1053 = vmatmul.f32.vlgmr.msrb.gmra.mxu3 %v3347_v43 }
 0x32b   :  { %1281 = vmatpush.msra.mxu0 %v2802_v53  ;;  %1301 = vmatpush.msra.mxu1 %v3119_v32  ;;  %v3844_v53 = vld [vmem:[#allocation17_spill] sm:$0xff] }
 0x32c   :  { %1321 = vmatpush.msra.mxu2 %v3125_v35  ;;  %1341 = vmatpush.msrb.mxu3 %v2963_v57 }
 0x32d   :  { %1282 = vmatpush.msra.mxu0 %v2811_v47  ;;  %1302 = vmatpush.msra.mxu1 %v3133_v15  ;;  %v3845_v47 = vld [vmem:[#allocation5_spill] sm:$0xff] }
 0x32e   :  { %1322 = vmatpush.msra.mxu2 %v3139_v45  ;;  %1342 = vmatpush.msrb.mxu3 %v2972_v19 }
 0x32f   :  { %1283 = vmatpush.msra.mxu0 %v2820_v34  ;;  %1303 = vmatpush.msra.mxu1 %v3147_v50  ;;  %v3846_v34 = vld [vmem:[#allocation44_spill] sm:$0xff] }
 0x330   :  { %1323 = vmatpush.msra.mxu2 %v3153_v26  ;;  %1343 = vmatpush.msrb.mxu3 %v2981_v54 }
 0x331   :  { %1284 = vmatpush.msra.mxu0 %v2829_v55  ;;  %1304 = vmatpush.msra.mxu1 %v3161_v60  ;;  %v3847_v55 = vld [vmem:[#allocation18_spill] sm:$0xff] }
 0x332   :  { %1324 = vmatpush.msra.mxu2 %v3167_v16  ;;  %1344 = vmatpush.msrb.mxu3 %v2990_v56 }
 0x333   :  { %1285 = vmatpush.msra.mxu0 %v2838_v59  ;;  %1305 = vmatpush.msra.mxu1 %v3175_v41  ;;  %v3848_v59 = vld [vmem:[#allocation19_spill] sm:$0xff] }
 0x334   :  { %1325 = vmatpush.msra.mxu2 %v3181_v4  ;;  %1345 = vmatpush.msrb.mxu3 %v2999_v58 }
 0x335   :  { %1286 = vmatpush.msra.mxu0 %v2847_v2  ;;  %1306 = vmatpush.msra.mxu1 %v3189_v20  ;;  %v3849_v2 = vld [vmem:[#allocation26_spill] sm:$0xff] }
 0x336   :  { %1326 = vmatpush.msra.mxu2 %v3195_v29  ;;  %1346 = vmatpush.msrb.mxu3 %v3008_v63 }
 0x337   :  { %1287 = vmatpush.msra.mxu0 %v2856_v7  ;;  %1307 = vmatpush.msra.mxu1 %v3203_v36  ;;  %v3850_v7 = vld [vmem:[#allocation45_spill] sm:$0xff] }
 0x338   :  { %1327 = vmatpush.msra.mxu2 %v3209_v5  ;;  %1347 = vmatpush.msrb.mxu3 %v3017_v0 }
 0x339   :  { %1288 = vmatpush.msra.mxu0 %v2865_v12  ;;  %1308 = vmatpush.msra.mxu1 %v3217_v62  ;;  %v3851_v12 = vld [vmem:[#allocation8_spill] sm:$0xff] }
 0x33a   :  { %1328 = vmatpush.msra.mxu2 %v3223_v17  ;;  %1348 = vmatpush.msrb.mxu3 %v3026_v1 }
 0x33b   :  { %1289 = vmatpush.msra.mxu0 %v2874_v22  ;;  %1309 = vmatpush.msra.mxu1 %v3231_v11  ;;  %v3852_v22 = vld [vmem:[#allocation29_spill] sm:$0xff] }
 0x33c   :  { %1329 = vmatpush.msra.mxu2 %v3237_v51  ;;  %1349 = vmatpush.msrb.mxu3 %v3035_v3 }
 0x33d   :  { %1290 = vmatpush.msra.mxu0 %v2883_v27  ;;  %1310 = vmatpush.msra.mxu1 %v3245_v23  ;;  %v3853_v27 = vld [vmem:[#allocation7_spill] sm:$0xff] }
 0x33e   :  { %1330 = vmatpush.msra.mxu2 %v3844_v53  ;;  %1350 = vmatpush.msrb.mxu3 %v3845_v47 }
 0x33f   :  { %1291 = vmatpush.msra.mxu0 %v3846_v34  ;;  %1311 = vmatpush.msra.mxu1 %v3847_v55 }
 0x340   :  { %1331 = vmatpush.msra.mxu2 %v3848_v59  ;;  %1351 = vmatpush.msrb.mxu3 %v3849_v2 }
 0x341   :  { %1292 = vmatpush.msra.mxu0 %v3850_v7  ;;  %1312 = vmatpush.msra.mxu1 %v3851_v12  ;;  %v3872_v7 = vld [vmem:[#allocation25_spill] sm:$0xff] }
 0x342   :  { %1332 = vmatpush.msra.mxu2 %v3852_v22  ;;  %1352 = vmatpush.msrb.mxu3 %v3853_v27 }
 0x343   :  { %1293 = vmatpush.msra.mxu0 %v3854_v31  ;;  %1313 = vmatpush.msra.mxu1 %v3855_v9 }
 0x344   :  { %1333 = vmatpush.msra.mxu2 %v3856_v10  ;;  %1353 = vmatpush.msrb.mxu3 %v3857_v6 }
 0x345   :  { %1294 = vmatpush.msra.mxu0 %v3858_v48  ;;  %1314 = vmatpush.msra.mxu1 %v3859_v61 }
 0x346   :  { %1334 = vmatpush.msra.mxu2 %v3860_v33  ;;  %1354 = vmatpush.msrb.mxu3 %v3861_v52 }
 0x347   :  { %1295 = vmatpush.msra.mxu0 %v3862_v8  ;;  %1315 = vmatpush.msra.mxu1 %v3863_v49 }
 0x348   :  { %1335 = vmatpush.msra.mxu2 %v3864_v30  ;;  %1355 = vmatpush.msrb.mxu3 %v3865_v28 }
 0x349   :  { %1296 = vmatpush.msra.mxu0 %v3866_v24  ;;  %1316 = vmatpush.msra.mxu1 %v3867_v40 }
 0x34a   :  { %1336 = vmatpush.msra.mxu2 %v3868_v44  ;;  %1356 = vmatpush.msrb.mxu3 %v3869_v38 }
 0x3a6   :  { %v994_v46 = vpop.f32.mrf.mxu0  ;;  %v1014_v37 = vpop.f32.mrf.mxu1 }
 0x3a7   :  { %v1057_v39 = vadd.f32 %v994_v46, %v3870_v21  ;;  %v1058_v13 = vadd.f32 %v1014_v37, %v3871_v25  ;;  %v3873_v37 = vld [vmem:[#allocation36_spill] sm:$0xff] }
 0x3a9   :  { %v1674_v42 = vmul.f32 -1.442695, %v1057_v39  ;;  %v1675_v14 = vmul.f32 -1.442695, %v1058_v13 }
 0x3ab   :  { %1768 = vpow2.f32 %v1674_v42 }
 0x3ac   :  { %1770 = vpow2.f32 %v1675_v14 }
 0x3ad   :  { %v1054_v34 = vpop.f32.mrf.mxu3  ;;  %v1034_v38 = vpop.f32.mrf.mxu2 }
 0x3ae   :  { %v1060_v31 = vadd.f32 %v1054_v34, %v3872_v7  ;;  %v1059_v39 = vadd.f32 %v1034_v38, %v3873_v37 }
 0x3b0   :  { %v1676_v48 = vmul.f32 -1.442695, %v1060_v31 }
 0x3b1   :  { %v1769_v8 = vpop.eup %1768 }
 0x3b2   :  { %v1771_v24 = vpop.eup %1770  ;;  %v1064_v43 = vadd.f32 1.0, %v1769_v8  ;;  %1772 = vpow2.f32 %v1676_v48 }
 0x3b3   :  { %v1083_v44 = vadd.f32 1.0, %v1771_v24 }
 0x3b4   :  { %1774 = vrcp.f32 %v1064_v43  ;;  %v1076_v7 = vand.u32 2147483648, %v1064_v43  ;;  %v1074_v48 = vand.u32 2147483647, %v1064_v43  ;;  %vm1070_vm2 = vweird.f32 %v1064_v43 }
 0x3b5   :  { %1776 = vrcp.f32 %v1083_v44  ;;  %v1095_v31 = vand.u32 2147483648, %v1083_v44  ;;  %v1093_v28 = vand.u32 2147483647, %v1083_v44  ;;  %vm1089_vm3 = vweird.f32 %v1083_v44 }
 0x3b6   :  { %v1077_v38 = vor.u32 1.1754944e-38, %v1076_v7  ;;  %vm1075_vm6 = vcmp.eq.f32.partialorder %v1074_v48, 8.507059e+37 }
 0x3b7   :  { %vm1094_vm7 = vcmp.eq.f32.partialorder %v1093_v28, 8.507059e+37 }
 0x3b8   :  { %v1773_v40 = vpop.eup %1772 }
 0x3b9   :  { %v1103_v46 = vadd.f32 1.0, %v1773_v40 }
 0x3ba   :  { %v1775_v21 = vpop.eup %1774 }
 0x3bb   :  { %v1777_v25 = vpop.eup %1776  ;;  %v1066_v13 = vmul.f32 %v1775_v21, %v1064_v43  ;;  %1778 = vrcp.f32 %v1103_v46  ;;  %vm1071_vm0 = vweird.f32 %v1775_v21  ;;  %v1115_v7 = vand.u32 2147483648, %v1103_v46 }
 0x3bc   :  { %v1085_v42 = vmul.f32 %v1777_v25, %v1083_v44  ;;  %1780 = vtanh.f32 %v1059_v39  ;;  %vm1090_vm1 = vweird.f32 %v1777_v25  ;;  %vm1072_vm4 = vmor %vm1070_vm2, %vm1071_vm0  ;;  %vm1109_vm9 = vweird.f32 %v1103_v46 }
 0x3bd   :  { %v1067_v14 = vsub.f32 1.0, %v1066_v13  ;;  %vm1091_vm5 = vmor %vm1089_vm3, %vm1090_vm1  ;;  %v1096_v13 = vor.u32 1.1754944e-38, %v1095_v31  ;;  %v1116_v48 = vor.u32 1.1754944e-38, %v1115_v7 }
 0x3be   :  { %v1086_v34 = vsub.f32 1.0, %v1085_v42 }
 0x3bf   :  { %v1068_v8 = vmul.f32 %v1775_v21, %v1067_v14 }
 0x3c0   :  { %v1087_v24 = vmul.f32 %v1777_v25, %v1086_v34 }
 0x3c1   :  { %v1779_v30 = vpop.eup %1778  ;;  %v1069_v40 = vadd.f32 %v1775_v21, %v1068_v8 }
 0x3c2   :  { %v1088_v37 = vadd.f32 %v1777_v25, %v1087_v24  ;;  %v1105_v49 = vmul.f32 %v1779_v30, %v1103_v46  ;;  %v1781_v39 = vpop.eup %1780  ;;  %vm1110_vm8 = vweird.f32 %v1779_v30 }
 0x3c3   :  { %v1073_v42 = vsel %vm1072_vm4, %v1775_v21, %v1069_v40  ;;  %v1113_v21 = vand.u32 2147483647, %v1103_v46  ;;  %vm1111_vm10 = vmor %vm1109_vm9, %vm1110_vm8  ;;  %v3887_v40 = vld [vmem:[#allocation38_spill] sm:$0xff] }
 0x3c4   :  { %v1078_v52 = vsel %vm1075_vm6, %v1077_v38, %v1073_v42  ;;  %v1092_v14 = vsel %vm1091_vm5, %v1777_v25, %v1088_v37  ;;  %v1106_v33 = vsub.f32 1.0, %v1105_v49 }
 0x3c5   :  { %v1097_v34 = vsel %vm1094_vm7, %v1096_v13, %v1092_v14  ;;  %v1120_v61 = vmul.f32 %v1781_v39, %v1078_v52  ;;  %vm1114_vm11 = vcmp.eq.f32.partialorder %v1113_v21, 8.507059e+37 }
 0x3c6   :  { %v1119_v6 = vmul.f32 %v1097_v34, %v3344_v18  ;;  %v1107_v8 = vmul.f32 %v1779_v30, %v1106_v33  ;;  %v1896_v18 = vld [vmem:[%s3646_s2 + $0x1e0] sm:$0xff] }
 0x3c8   :  { %v3422_v43 = vadd.f32 %v1120_v61, %v1119_v6  ;;  %v1108_v44 = vadd.f32 %v1779_v30, %v1107_v8  ;;  %v1897_v6 = vld [vmem:[%s3646_s2 + $0x1c0] sm:$0xff] }
 0x3c9   :  { %v1898_v61 = vld [vmem:[%s3646_s2 + $0x1a0] sm:$0xff] }
 0x3ca   :  { %1782 = vtanh.f32 %v3422_v43  ;;  %v1112_v31 = vsel %vm1111_vm10, %v1779_v30, %v1108_v44 }
 0x3cb   :  { %v1117_v49 = vsel %vm1114_vm11, %v1116_v48, %v1112_v31 }
 0x3d0   :  { %v1783_v28 = vpop.eup %1782 }
 0x3d1   :  { %v3425_v25 = vmul.f32 %v1783_v28, %v1117_v49 }
 0x3d3   :  { %1145 = vmatmul.f32.vlgmr.msrb.gmra.mxu0 %v3425_v25  ;;  %1165 = vmatmul.f32.vlgmr.msrb.gmra.mxu1 %v3425_v25 }
 0x3d4   :  { %1185 = vmatmul.f32.vlgmr.msrb.gmra.mxu2 %v3425_v25  ;;  %1205 = vmatmul.f32.vlgmr.msra.gmra.mxu3 %v3425_v25 }
 0x3d5   :  { %1433 = vmatpush.msrb.mxu0 %v1896_v18  ;;  %1453 = vmatpush.msrb.mxu1 %v3119_v32  ;;  %v1908_v32 = vld [vmem:[%s3646_s2 + $0x60] sm:$0xff] }
 0x3d6   :  { %1473 = vmatpush.msrb.mxu2 %v3125_v35  ;;  %1493 = vmatpush.msra.mxu3 %v2963_v57  ;;  %v1899_v57 = vld [vmem:[%s3646_s2 + $0x180] sm:$0xff]  ;;  %v3874_v35 = vld [vmem:[#allocation27_spill] sm:$0xff] }
 0x3d7   :  { %1434 = vmatpush.msrb.mxu0 %v1897_v6  ;;  %1454 = vmatpush.msrb.mxu1 %v3133_v15  ;;  %v1909_v15 = vld [vmem:[%s3646_s2 + $0x40] sm:$0xff] }
 0x3d8   :  { %1474 = vmatpush.msrb.mxu2 %v3139_v45  ;;  %1494 = vmatpush.msra.mxu3 %v2972_v19  ;;  %v1900_v19 = vld [vmem:[%s3646_s2 + $0x160] sm:$0xff]  ;;  %v3875_v45 = vld [vmem:[#allocation47_spill] sm:$0xff] }
 0x3d9   :  { %1435 = vmatpush.msrb.mxu0 %v1898_v61  ;;  %1455 = vmatpush.msrb.mxu1 %v3147_v50  ;;  %v3876_v50 = vld [vmem:[#allocation48_spill] sm:$0xff] }
 0x3da   :  { %1475 = vmatpush.msrb.mxu2 %v3153_v26  ;;  %1495 = vmatpush.msra.mxu3 %v2981_v54  ;;  %v1901_v54 = vld [vmem:[%s3646_s2 + $0x140] sm:$0xff]  ;;  %v3877_v26 = vld [vmem:[#allocation14_spill] sm:$0xff] }
 0x3db   :  { %1436 = vmatpush.msrb.mxu0 %v1899_v57  ;;  %1456 = vmatpush.msrb.mxu1 %v3161_v60  ;;  %v1910_v60 = vld [vmem:[%s3646_s2 + $0x20] sm:$0xff] }
 0x3dc   :  { %1476 = vmatpush.msrb.mxu2 %v3167_v16  ;;  %1496 = vmatpush.msra.mxu3 %v2990_v56  ;;  %v1902_v56 = vld [vmem:[%s3646_s2 + $0x120] sm:$0xff]  ;;  %v3878_v16 = vld [vmem:[#allocation49_spill] sm:$0xff] }
 0x3dd   :  { %1437 = vmatpush.msrb.mxu0 %v1900_v19  ;;  %1457 = vmatpush.msrb.mxu1 %v3175_v41  ;;  %v3879_v41 = vld [vmem:[#allocation50_spill] sm:$0xff] }
 0x3de   :  { %1477 = vmatpush.msrb.mxu2 %v3181_v4  ;;  %1497 = vmatpush.msra.mxu3 %v2999_v58  ;;  %v1903_v58 = vld [vmem:[%s3646_s2 + $0x100] sm:$0xff]  ;;  %v3880_v4 = vld [vmem:[#allocation13_spill] sm:$0xff] }
 0x3df   :  { %1438 = vmatpush.msrb.mxu0 %v1901_v54  ;;  %1458 = vmatpush.msrb.mxu1 %v3189_v20  ;;  %v1911_v20 = vld [vmem:[%s3646_s2] sm:$0xff] }
 0x3e0   :  { %1478 = vmatpush.msrb.mxu2 %v3195_v29  ;;  %1498 = vmatpush.msra.mxu3 %v3008_v63  ;;  %v1904_v63 = vld [vmem:[%s3646_s2 + $0xe0] sm:$0xff]  ;;  %v3881_v29 = vld [vmem:[#allocation51_spill] sm:$0xff] }
 0x3e1   :  { %1439 = vmatpush.msrb.mxu0 %v1902_v56  ;;  %1459 = vmatpush.msrb.mxu1 %v3203_v36  ;;  %v3882_v36 = vld [vmem:[#allocation52_spill] sm:$0xff] }
 0x3e2   :  { %1479 = vmatpush.msrb.mxu2 %v3209_v5  ;;  %1499 = vmatpush.msra.mxu3 %v3017_v0  ;;  %v1905_v0 = vld [vmem:[%s3646_s2 + $0xc0] sm:$0xff]  ;;  %v3883_v5 = vld [vmem:[#allocation15_spill] sm:$0xff] }
 0x3e3   :  { %1440 = vmatpush.msrb.mxu0 %v1903_v58  ;;  %1460 = vmatpush.msrb.mxu1 %v3217_v62 }
 0x3e4   :  { %1480 = vmatpush.msrb.mxu2 %v3223_v17  ;;  %1500 = vmatpush.msra.mxu3 %v3026_v1  ;;  %v1906_v1 = vld [vmem:[%s3646_s2 + $0xa0] sm:$0xff] }
 0x3e5   :  { %1441 = vmatpush.msrb.mxu0 %v1904_v63  ;;  %1461 = vmatpush.msrb.mxu1 %v3231_v11  ;;  %v3884_v11 = vld [vmem:[#allocation6_spill] sm:$0xff] }
 0x3e6   :  { %1481 = vmatpush.msrb.mxu2 %v3237_v51  ;;  %1501 = vmatpush.msra.mxu3 %v3035_v3  ;;  %v1907_v3 = vld [vmem:[%s3646_s2 + $0x80] sm:$0xff] }
 0x3e7   :  { %1442 = vmatpush.msrb.mxu0 %v1905_v0  ;;  %1462 = vmatpush.msrb.mxu1 %v3245_v23  ;;  %v3885_v23 = vld [vmem:[#allocation37_spill] sm:$0xff] }
 0x3e8   :  { %1482 = vmatpush.msrb.mxu2 %v3844_v53  ;;  %1502 = vmatpush.msra.mxu3 %v3845_v47 }
 0x3e9   :  { %1443 = vmatpush.msrb.mxu0 %v1906_v1  ;;  %1463 = vmatpush.msrb.mxu1 %v3847_v55 }
 0x3ea   :  { %1483 = vmatpush.msrb.mxu2 %v3848_v59  ;;  %1503 = vmatpush.msra.mxu3 %v3849_v2  ;;  %v3886_v2 = vld [vmem:[#allocation28_spill] sm:$0xff] }
 0x3eb   :  { %1444 = vmatpush.msrb.mxu0 %v1907_v3  ;;  %1464 = vmatpush.msrb.mxu1 %v3851_v12 }
 0x3ec   :  { %1484 = vmatpush.msrb.mxu2 %v3852_v22  ;;  %1504 = vmatpush.msra.mxu3 %v3853_v27 }
 0x3ed   :  { %1445 = vmatpush.msrb.mxu0 %v1908_v32  ;;  %1465 = vmatpush.msrb.mxu1 %v3855_v9 }
 0x3ee   :  { %1485 = vmatpush.msrb.mxu2 %v3856_v10  ;;  %1505 = vmatpush.msra.mxu3 %v3874_v35 }
 0x3ef   :  { %1446 = vmatpush.msrb.mxu0 %v1909_v15  ;;  %1466 = vmatpush.msrb.mxu1 %v3875_v45 }
 0x3f0   :  { %1486 = vmatpush.msrb.mxu2 %v3876_v50  ;;  %1506 = vmatpush.msra.mxu3 %v3877_v26 }
 0x3f1   :  { %1447 = vmatpush.msrb.mxu0 %v1910_v60  ;;  %1467 = vmatpush.msrb.mxu1 %v3878_v16 }
 0x3f2   :  { %1487 = vmatpush.msrb.mxu2 %v3879_v41  ;;  %1507 = vmatpush.msra.mxu3 %v3880_v4  ;;  %v1603_v4 = vld [vmem:[%s3649_s4 + $0x70] sm:$0xff] }
 0x3f3   :  { %1448 = vmatpush.msrb.mxu0 %v1911_v20  ;;  %1468 = vmatpush.msrb.mxu1 %v3881_v29  ;;  %v1602_v20 = vld [vmem:[%s3649_s4 + $0x68] sm:$0xff]  ;;  %v1601_v29 = vld [vmem:[%s3649_s4 + $0x60] sm:$0xff] }
 0x3f4   :  { %1488 = vmatpush.msrb.mxu2 %v3882_v36  ;;  %1508 = vmatpush.msra.mxu3 %v3883_v5  ;;  %v1600_v36 = vld [vmem:[%s3649_s4 + $0x58] sm:$0xff] }
 0x450   :  { %v1146_v62 = vpop.f32.mrf.mxu0  ;;  %v1166_v17 = vpop.f32.mrf.mxu1 }
 0x451   :  { %v1209_v51 = vadd.f32 %v1146_v62, %v3884_v11  ;;  %v1210_v53 = vadd.f32 %v1166_v17, %v3885_v23  ;;  %v1599_v17 = vld [vmem:[%s3649_s4 + $0x50] sm:$0xff]  ;;  %v3888_v11 = vld [vmem:[#allocation20_spill] sm:$0xff]  ;;  %v3889_v23 = vld [vmem:[#allocation39_spill] sm:$0xff] }
 0x453   :  { %v1677_v47 = vmul.f32 -1.442695, %v1209_v51  ;;  %v1678_v55 = vmul.f32 -1.442695, %v1210_v53 }
 0x455   :  { %1784 = vpow2.f32 %v1677_v47  ;;  %v1598_v47 = vld [vmem:[%s3649_s4 + $0x48] sm:$0xff] }
 0x456   :  { %1786 = vpow2.f32 %v1678_v55 }
 0x457   :  { %v1206_v59 = vpop.f32.mrf.mxu3  ;;  %v1186_v52 = vpop.f32.mrf.mxu2 }
 0x458   :  { %v1212_v12 = vadd.f32 %v1206_v59, %v3886_v2  ;;  %v1211_v38 = vadd.f32 %v1186_v52, %v3887_v40  ;;  %v1597_v2 = vld [vmem:[%s3649_s4 + $0x40] sm:$0xff] }
 0x45a   :  { %v1679_v22 = vmul.f32 -1.442695, %v1212_v12  ;;  %v1596_v12 = vld [vmem:[%s3649_s4 + $0x38] sm:$0xff] }
 0x45b   :  { %v1785_v27 = vpop.eup %1784 }
 0x45c   :  { %v1787_v9 = vpop.eup %1786  ;;  %v1216_v10 = vadd.f32 1.0, %v1785_v27  ;;  %1788 = vpow2.f32 %v1679_v22  ;;  %v1595_v22 = vld [vmem:[%s3649_s4 + $0x30] sm:$0xff] }
 0x45d   :  { %v1235_v33 = vadd.f32 1.0, %v1787_v9  ;;  %v3890_v9 = vld [vmem:[#allocation31_spill] sm:$0xff] }
 0x45e   :  { %1790 = vrcp.f32 %v1216_v10  ;;  %v1228_v34 = vand.u32 2147483648, %v1216_v10  ;;  %v1226_v7 = vand.u32 2147483647, %v1216_v10  ;;  %vm1222_vm14 = vweird.f32 %v1216_v10 }
 0x45f   :  { %1792 = vrcp.f32 %v1235_v33  ;;  %v1247_v8 = vand.u32 2147483648, %v1235_v33  ;;  %v1245_v31 = vand.u32 2147483647, %v1235_v33  ;;  %vm1241_vm15 = vweird.f32 %v1235_v33 }
 0x460   :  { %v1229_v49 = vor.u32 1.1754944e-38, %v1228_v34  ;;  %vm1227_vm2 = vcmp.eq.f32.partialorder %v1226_v7, 8.507059e+37  ;;  %v1589_v34 = vld [vmem:[%s3649_s4] sm:$0xff] }
 0x461   :  { %v1248_v61 = vor.u32 1.1754944e-38, %v1247_v8  ;;  %vm1246_vm3 = vcmp.eq.f32.partialorder %v1245_v31, 8.507059e+37  ;;  %v3891_v7 = vld [vmem:[#allocation40_spill] sm:$0xff] }
 0x462   :  { %v1789_v30 = vpop.eup %1788 }
 0x463   :  { %v1255_v46 = vadd.f32 1.0, %v1789_v30  ;;  %v1593_v30 = vld [vmem:[%s3649_s4 + $0x20] sm:$0xff] }
 0x464   :  { %v1791_v24 = vpop.eup %1790 }
 0x465   :  { %v1793_v37 = vpop.eup %1792  ;;  %v1218_v13 = vmul.f32 %v1791_v24, %v1216_v10  ;;  %1794 = vrcp.f32 %v1255_v46  ;;  %vm1223_vm12 = vweird.f32 %v1791_v24  ;;  %v1267_v15 = vand.u32 2147483648, %v1255_v46 }
 0x466   :  { %v1237_v42 = vmul.f32 %v1793_v37, %v1235_v33  ;;  %1796 = vtanh.f32 %v1211_v38  ;;  %vm1242_vm13 = vweird.f32 %v1793_v37  ;;  %vm1224_vm0 = vmor %vm1222_vm14, %vm1223_vm12  ;;  %vm1261_vm5 = vweird.f32 %v1255_v46  ;;  %v1594_v33 = vld [vmem:[%s3649_s4 + $0x28] sm:$0xff] }
 0x467   :  { %v1219_v39 = vsub.f32 1.0, %v1218_v13  ;;  %vm1243_vm1 = vmor %vm1241_vm15, %vm1242_vm13  ;;  %v1265_v45 = vand.u32 2147483647, %v1255_v46  ;;  %v1268_v26 = vor.u32 1.1754944e-38, %v1267_v15  ;;  %v1591_v13 = vld [vmem:[%s3649_s4 + $0x10] sm:$0xff] }
 0x468   :  { %v1238_v14 = vsub.f32 1.0, %v1237_v42  ;;  %v1590_v42 = vld [vmem:[%s3649_s4 + $0x8] sm:$0xff] }
 0x469   :  { %v1220_v44 = vmul.f32 %v1791_v24, %v1219_v39  ;;  %vm1266_vm7 = vcmp.eq.f32.partialorder %v1265_v45, 8.507059e+37 }
 0x46a   :  { %v1239_v21 = vmul.f32 %v1793_v37, %v1238_v14 }
 0x46b   :  { %v1795_v48 = vpop.eup %1794  ;;  %v1221_v28 = vadd.f32 %v1791_v24, %v1220_v44 }
 0x46c   :  { %v1240_v18 = vadd.f32 %v1793_v37, %v1239_v21  ;;  %v1257_v6 = vmul.f32 %v1795_v48, %v1255_v46  ;;  %v1797_v19 = vpop.eup %1796  ;;  %vm1262_vm4 = vweird.f32 %v1795_v48 }
 0x46d   :  { %v1225_v57 = vsel %vm1224_vm0, %v1791_v24, %v1221_v28  ;;  %vm1263_vm6 = vmor %vm1261_vm5, %vm1262_vm4 }
 0x46e   :  { %v1230_v54 = vsel %vm1227_vm2, %v1229_v49, %v1225_v57  ;;  %v1244_v56 = vsel %vm1243_vm1, %v1793_v37, %v1240_v18  ;;  %v1258_v58 = vsub.f32 1.0, %v1257_v6  ;;  %v1592_v37 = vld [vmem:[%s3649_s4 + $0x18] sm:$0xff] }
 0x46f   :  { %v1249_v63 = vsel %vm1246_vm3, %v1248_v61, %v1244_v56  ;;  %v1272_v0 = vmul.f32 %v1797_v19, %v1230_v54 }
 0x470   :  { %v1271_v1 = vmul.f32 %v1249_v63, %v3422_v43  ;;  %v1259_v3 = vmul.f32 %v1795_v48, %v1258_v58  ;;  %v1604_v43 = vld [vmem:[%s3649_s4 + $0x78] sm:$0xff] }
 0x472   :  { %v3532_v32 = vadd.f32 %v1272_v0, %v1271_v1  ;;  %v1260_v35 = vadd.f32 %v1795_v48, %v1259_v3 }
 0x474   :  { %1798 = vtanh.f32 %v3532_v32  ;;  %v1264_v50 = vsel %vm1263_vm6, %v1795_v48, %v1260_v35 }
 0x475   :  { %v1269_v16 = vsel %vm1266_vm7, %v1268_v26, %v1264_v50 }
 0x47a   :  { %v1799_v60 = vpop.eup %1798 }
 0x47b   :  { %v3535_v41 = vmul.f32 %v1799_v60, %v1269_v16 }
 0x47d   :  { %1297 = vmatmul.f32.vlgmr.msra.gmra.mxu0 %v3535_v41  ;;  %1317 = vmatmul.f32.vlgmr.msra.gmra.mxu1 %v3535_v41 }
 0x47e   :  { %1337 = vmatmul.f32.vlgmr.msra.gmra.mxu2 %v3535_v41  ;;  %1357 = vmatmul.f32.vlgmr.msrb.gmra.mxu3 %v3535_v41 }
 0x47f   :  { %1609 = vmatpush.msra.mxu0 %v1604_v43 }
 0x481   :  { %1610 = vmatpush.msra.mxu0 %v1603_v4 }
 0x483   :  { %1611 = vmatpush.msra.mxu0 %v1602_v20 }
 0x485   :  { %1612 = vmatpush.msra.mxu0 %v1601_v29 }
 0x487   :  { %1613 = vmatpush.msra.mxu0 %v1600_v36 }
 0x489   :  { %1614 = vmatpush.msra.mxu0 %v1599_v17 }
 0x48b   :  { %1615 = vmatpush.msra.mxu0 %v1598_v47  ;;  %v3893_v47 = vld [vmem:[#allocation12_spill] sm:$0xff] }
 0x48d   :  { %1616 = vmatpush.msra.mxu0 %v1597_v2 }
 0x48f   :  { %1617 = vmatpush.msra.mxu0 %v1596_v12 }
 0x491   :  { %1618 = vmatpush.msra.mxu0 %v1595_v22  ;;  %v3896_v22 = vld [vmem:[#allocation23_spill] sm:$0xff] }
 0x493   :  { %1619 = vmatpush.msra.mxu0 %v1594_v33 }
 0x495   :  { %1620 = vmatpush.msra.mxu0 %v1593_v30  ;;  %v3608_v30 = vld [vmem:[%s3650_s5] ss:$0 sm:$0xff] }
 0x497   :  { %1621 = vmatpush.msra.mxu0 %v1592_v37 }
 0x499   :  { %1622 = vmatpush.msra.mxu0 %v1591_v13 }
 0x49b   :  { %1623 = vmatpush.msra.mxu0 %v1590_v42 }
 0x49d   :  { %1624 = vmatpush.msra.mxu0 %v1589_v34 }
 0x4fa   :  { %v1298_v5 = vpop.f32.mrf.mxu0  ;;  %v1318_v62 = vpop.f32.mrf.mxu1 }
 0x4fb   :  { %v1361_v51 = vadd.f32 %v1298_v5, %v3888_v11  ;;  %v1362_v53 = vadd.f32 %v1318_v62, %v3889_v23 }
 0x4fd   :  { %v1680_v55 = vmul.f32 -1.442695, %v1361_v51  ;;  %v1681_v59 = vmul.f32 -1.442695, %v1362_v53 }
 0x4ff   :  { %1800 = vpow2.f32 %v1680_v55  ;;  %v3894_v55 = vld [vmem:[#allocation16_spill] sm:$0xff] }
 0x500   :  { %1802 = vpow2.f32 %v1681_v59  ;;  %v3895_v59 = vld [vmem:[#allocation22_spill] sm:$0xff] }
 0x501   :  { %v1358_v27 = vpop.f32.mrf.mxu3  ;;  %v1338_v39 = vpop.f32.mrf.mxu2 }
 0x502   :  { %v1364_v10 = vadd.f32 %v1358_v27, %v3890_v9  ;;  %v1363_v21 = vadd.f32 %v1338_v39, %v3891_v7  ;;  %v3897_v9 = vld [vmem:[#allocation41_spill] sm:$0xff] }
 0x504   :  { %v1682_v52 = vmul.f32 -1.442695, %v1364_v10 }
 0x505   :  { %v1801_v46 = vpop.eup %1800 }
 0x506   :  { %v1803_v24 = vpop.eup %1802  ;;  %v1368_v40 = vadd.f32 1.0, %v1801_v46  ;;  %1804 = vpow2.f32 %v1682_v52 }
 0x507   :  { %v1387_v38 = vadd.f32 1.0, %v1803_v24 }
 0x508   :  { %1806 = vrcp.f32 %v1368_v40  ;;  %v1380_v6 = vand.u32 2147483648, %v1368_v40  ;;  %v1378_v19 = vand.u32 2147483647, %v1368_v40  ;;  %vm1374_vm10 = vweird.f32 %v1368_v40 }
 0x509   :  { %1808 = vrcp.f32 %v1387_v38  ;;  %v1399_v61 = vand.u32 2147483648, %v1387_v38  ;;  %v1397_v56 = vand.u32 2147483647, %v1387_v38  ;;  %vm1393_vm11 = vweird.f32 %v1387_v38 }
 0x50a   :  { %v1381_v0 = vor.u32 1.1754944e-38, %v1380_v6  ;;  %vm1379_vm14 = vcmp.eq.f32.partialorder %v1378_v19, 8.507059e+37 }
 0x50b   :  { %v1400_v35 = vor.u32 1.1754944e-38, %v1399_v61  ;;  %vm1398_vm15 = vcmp.eq.f32.partialorder %v1397_v56, 8.507059e+37 }
 0x50c   :  { %v1805_v14 = vpop.eup %1804 }
 0x50d   :  { %v1407_v8 = vadd.f32 1.0, %v1805_v14 }
 0x50e   :  { %v1807_v44 = vpop.eup %1806 }
 0x50f   :  { %v1809_v31 = vpop.eup %1808  ;;  %v1370_v48 = vmul.f32 %v1807_v44, %v1368_v40  ;;  %1810 = vrcp.f32 %v1407_v8  ;;  %vm1375_vm8 = vweird.f32 %v1807_v44  ;;  %v1419_v5 = vand.u32 2147483648, %v1407_v8 }
 0x510   :  { %v1389_v28 = vmul.f32 %v1809_v31, %v1387_v38  ;;  %1812 = vtanh.f32 %v1363_v21  ;;  %vm1394_vm9 = vweird.f32 %v1809_v31  ;;  %vm1376_vm12 = vmor %vm1374_vm10, %vm1375_vm8  ;;  %vm1413_vm1 = vweird.f32 %v1407_v8 }
 0x511   :  { %v1371_v49 = vsub.f32 1.0, %v1370_v48  ;;  %vm1395_vm13 = vmor %vm1393_vm11, %vm1394_vm9  ;;  %v1417_v62 = vand.u32 2147483647, %v1407_v8  ;;  %v1420_v11 = vor.u32 1.1754944e-38, %v1419_v5 }
 0x512   :  { %v1390_v18 = vsub.f32 1.0, %v1389_v28 }
 0x513   :  { %v1372_v57 = vmul.f32 %v1807_v44, %v1371_v49  ;;  %vm1418_vm3 = vcmp.eq.f32.partialorder %v1417_v62, 8.507059e+37 }
 0x514   :  { %v1391_v54 = vmul.f32 %v1809_v31, %v1390_v18 }
 0x515   :  { %v1811_v58 = vpop.eup %1810  ;;  %v1373_v63 = vadd.f32 %v1807_v44, %v1372_v57 }
 0x516   :  { %v1392_v1 = vadd.f32 %v1809_v31, %v1391_v54  ;;  %v1409_v3 = vmul.f32 %v1811_v58, %v1407_v8  ;;  %v1813_v45 = vpop.eup %1812  ;;  %vm1414_vm0 = vweird.f32 %v1811_v58 }
 0x517   :  { %v1377_v15 = vsel %vm1376_vm12, %v1807_v44, %v1373_v63  ;;  %vm1415_vm2 = vmor %vm1413_vm1, %vm1414_vm0 }
 0x518   :  { %v1382_v50 = vsel %vm1379_vm14, %v1381_v0, %v1377_v15  ;;  %v1396_v26 = vsel %vm1395_vm13, %v1809_v31, %v1392_v1  ;;  %v1410_v60 = vsub.f32 1.0, %v1409_v3  ;;  %v3899_v31 = vld [vmem:[#allocation42_spill] sm:$0xff] }
 0x519   :  { %v1401_v16 = vsel %vm1398_vm15, %v1400_v35, %v1396_v26  ;;  %v1424_v43 = vmul.f32 %v1813_v45, %v1382_v50 }
 0x51a   :  { %v1423_v4 = vmul.f32 %v1401_v16, %v3532_v32  ;;  %v1411_v20 = vmul.f32 %v1811_v58, %v1410_v60  ;;  %v3892_v32 = vld [vmem:[#allocation43_spill] sm:$0xff] }
 0x51c   :  { %v3594_v29 = vadd.f32 %v1424_v43, %v1423_v4  ;;  %v1412_v36 = vadd.f32 %v1811_v58, %v1411_v20 }
 0x51e   :  { %1814 = vtanh.f32 %v3594_v29  ;;  %v1416_v17 = vsel %vm1415_vm2, %v1811_v58, %v1412_v36 }
 0x51f   :  { %v1421_v23 = vsel %vm1418_vm3, %v1420_v11, %v1416_v17 }
 0x524   :  { %v1815_v51 = vpop.eup %1814 }
 0x525   :  { %v1427_v53 = vmul.f32 %v1815_v51, %v1421_v23 }
 0x527   :  { %1449 = vmatmul.f32.vlgmr.msrb.gmra.mxu0 %v1427_v53  ;;  %1469 = vmatmul.f32.vlgmr.msrb.gmra.mxu1 %v1427_v53 }
 0x528   :  { %1489 = vmatmul.f32.vlgmr.msrb.gmra.mxu2 %v1427_v53  ;;  %1509 = vmatmul.f32.vlgmr.msra.gmra.mxu3 %v1427_v53 }
 0x52f   :  { %1625 = vmatmul.f32.vlgmr.msra.gmra.mxu0 %v3892_v32 }
 0x537   :  { %1628 = vmatmul.f32.gmra.mxu0 %v3893_v47 }
 0x53f   :  { %1631 = vmatmul.f32.gmra.mxu0 %v3894_v55 }
 0x547   :  { %1634 = vmatmul.f32.gmra.mxu0 %v3895_v59 }
 0x54f   :  { %1637 = vmatmul.f32.gmra.mxu0 %v3425_v25  ;;  %v3898_v25 = vld [vmem:[#allocation34_spill] sm:$0xff] }
 0x557   :  { %1640 = vmatmul.f32.gmra.mxu0 %v3535_v41 }
 0x55f   :  { %1643 = vmatmul.f32.gmra.mxu0 %v1427_v53 }
 0x5a4   :  { %v1450_v2 = vpop.f32.mrf.mxu0  ;;  %v1470_v12 = vpop.f32.mrf.mxu1 }
 0x5a5   :  { %v1513_v27 = vadd.f32 %v1450_v2, %v3896_v22  ;;  %v1514_v10 = vadd.f32 %v1470_v12, %v3897_v9 }
 0x5a7   :  { %v1683_v33 = vmul.f32 -1.442695, %v1513_v27  ;;  %v1684_v52 = vmul.f32 -1.442695, %v1514_v10 }
 0x5a9   :  { %1816 = vpow2.f32 %v1683_v33 }
 0x5aa   :  { %1818 = vpow2.f32 %v1684_v52 }
 0x5ab   :  { %v1510_v46 = vpop.f32.mrf.mxu3  ;;  %v1490_v34 = vpop.f32.mrf.mxu2 }
 0x5ac   :  { %v1516_v24 = vadd.f32 %v1510_v46, %v3898_v25  ;;  %v1626_v41 = vpop.f32.mrf.mxu0  ;;  %v1515_v48 = vadd.f32 %v1490_v34, %v3899_v31 }
 0x5ad   :  { %v1627_v40 = vadd.f32 %v3608_v30, %v1626_v41 }
 0x5ae   :  { %v1685_v38 = vmul.f32 -1.442695, %v1516_v24 }
 0x5af   :  { %v1817_v37 = vpop.eup %1816  ;;  %1650 = vst [vmem:[%s3651_s6] sm:$0xff] %v1627_v40 }
 0x5b0   :  { %v1819_v13 = vpop.eup %1818  ;;  %v1520_v42 = vadd.f32 1.0, %v1817_v37  ;;  %1820 = vpow2.f32 %v1685_v38 }
 0x5b1   :  { %v1539_v39 = vadd.f32 1.0, %v1819_v13 }
 0x5b2   :  { %1822 = vrcp.f32 %v1520_v42  ;;  %v1530_v57 = vand.u32 2147483647, %v1520_v42  ;;  %v1532_v19 = vand.u32 2147483648, %v1520_v42  ;;  %vm1526_vm6 = vweird.f32 %v1520_v42 }
 0x5b3   :  { %1824 = vrcp.f32 %v1539_v39  ;;  %v1551_v56 = vand.u32 2147483648, %v1539_v39  ;;  %v1549_v1 = vand.u32 2147483647, %v1539_v39  ;;  %vm1545_vm7 = vweird.f32 %v1539_v39 }
 0x5b4   :  { %v1629_v14 = vpop.f32.mrf.mxu0  ;;  %v1533_v15 = vor.u32 1.1754944e-38, %v1532_v19  ;;  %vm1531_vm9 = vcmp.eq.f32.partialorder %v1530_v57, 8.507059e+37 }
 0x5b5   :  { %v1630_v8 = vadd.f32 %v3608_v30, %v1629_v14  ;;  %v1552_v26 = vor.u32 1.1754944e-38, %v1551_v56  ;;  %vm1550_vm11 = vcmp.eq.f32.partialorder %v1549_v1, 8.507059e+37 }
 0x5b6   :  { %v1821_v44 = vpop.eup %1820 }
 0x5b7   :  { %v1559_v7 = vadd.f32 1.0, %v1821_v44  ;;  %1651 = vst [vmem:[%s3651_s6 + $0x8] sm:$0xff] %v1630_v8 }
 0x5b8   :  { %v1823_v21 = vpop.eup %1822 }
 0x5b9   :  { %v1825_v28 = vpop.eup %1824  ;;  %v1522_v49 = vmul.f32 %v1823_v21, %v1520_v42  ;;  %1826 = vrcp.f32 %v1559_v7  ;;  %vm1527_vm4 = vweird.f32 %v1823_v21  ;;  %v1571_v32 = vand.u32 2147483648, %v1559_v7 }
 0x5ba   :  { %v1541_v18 = vmul.f32 %v1825_v28, %v1539_v39  ;;  %1828 = vtanh.f32 %v1515_v48  ;;  %vm1546_vm5 = vweird.f32 %v1825_v28  ;;  %vm1528_vm8 = vmor %vm1526_vm6, %vm1527_vm4  ;;  %vm1565_vm13 = vweird.f32 %v1559_v7 }
 0x5bb   :  { %v1523_v6 = vsub.f32 1.0, %v1522_v49  ;;  %vm1547_vm10 = vmor %vm1545_vm7, %vm1546_vm5  ;;  %v1569_v47 = vand.u32 2147483647, %v1559_v7  ;;  %v1572_v2 = vor.u32 1.1754944e-38, %v1571_v32 }
 0x5bc   :  { %v1542_v61 = vsub.f32 1.0, %v1541_v18  ;;  %v1632_v54 = vpop.f32.mrf.mxu0 }
 0x5bd   :  { %v1524_v58 = vmul.f32 %v1823_v21, %v1523_v6  ;;  %v1633_v63 = vadd.f32 %v3608_v30, %v1632_v54  ;;  %vm1570_vm15 = vcmp.eq.f32.partialorder %v1569_v47, 8.507059e+37 }
 0x5be   :  { %v1543_v0 = vmul.f32 %v1825_v28, %v1542_v61 }
 0x5bf   :  { %v1827_v3 = vpop.eup %1826  ;;  %v1525_v35 = vadd.f32 %v1823_v21, %v1524_v58  ;;  %1652 = vst [vmem:[%s3651_s6 + $0x10] sm:$0xff] %v1633_v63 }
 0x5c0   :  { %v1544_v45 = vadd.f32 %v1825_v28, %v1543_v0  ;;  %v1561_v50 = vmul.f32 %v1827_v3, %v1559_v7  ;;  %v1829_v16 = vpop.eup %1828  ;;  %vm1566_vm12 = vweird.f32 %v1827_v3 }
 0x5c1   :  { %v1529_v60 = vsel %vm1528_vm8, %v1823_v21, %v1525_v35  ;;  %vm1567_vm14 = vmor %vm1565_vm13, %vm1566_vm12 }
 0x5c2   :  { %v1534_v43 = vsel %vm1531_vm9, %v1533_v15, %v1529_v60  ;;  %v1548_v4 = vsel %vm1547_vm10, %v1825_v28, %v1544_v45  ;;  %v1562_v20 = vsub.f32 1.0, %v1561_v50 }
 0x5c3   :  { %v1576_v36 = vmul.f32 %v1829_v16, %v1534_v43  ;;  %v1553_v5 = vsel %vm1550_vm11, %v1552_v26, %v1548_v4 }
 0x5c4   :  { %v1635_v62 = vpop.f32.mrf.mxu0  ;;  %v1563_v17 = vmul.f32 %v1827_v3, %v1562_v20  ;;  %v1575_v11 = vmul.f32 %v1553_v5, %v3594_v29 }
 0x5c5   :  { %v1636_v51 = vadd.f32 %v3608_v30, %v1635_v62 }
 0x5c6   :  { %v1577_v23 = vadd.f32 %v1576_v36, %v1575_v11  ;;  %v1564_v53 = vadd.f32 %v1827_v3, %v1563_v17 }
 0x5c7   :  { %1653 = vst [vmem:[%s3651_s6 + $0x18] sm:$0xff] %v1636_v51 }
 0x5c8   :  { %1830 = vtanh.f32 %v1577_v23  ;;  %v1568_v55 = vsel %vm1567_vm14, %v1827_v3, %v1564_v53 }
 0x5c9   :  { %v1573_v22 = vsel %vm1570_vm15, %v1572_v2, %v1568_v55 }
 0x5cc   :  { %v1638_v59 = vpop.f32.mrf.mxu0 }
 0x5cd   :  { %v1639_v12 = vadd.f32 %v3608_v30, %v1638_v59 }
 0x5ce   :  { %v1831_v29 = vpop.eup %1830 }
 0x5cf   :  { %1654 = vst [vmem:[%s3651_s6 + $0x20] sm:$0xff] %v1639_v12  ;;  %v1579_v27 = vmul.f32 %v1831_v29, %v1573_v22 }
 0x5d1   :  { %1646 = vmatmul.f32.gmra.mxu0 %v1579_v27 }
 0x5d4   :  { %v1641_v9 = vpop.f32.mrf.mxu0 }
 0x5d5   :  { %v1642_v10 = vadd.f32 %v3608_v30, %v1641_v9 }
 0x5d7   :  { %1655 = vst [vmem:[%s3651_s6 + $0x28] sm:$0xff] %v1642_v10 }
 0x5dc   :  { %v1644_v33 = vpop.f32.mrf.mxu0 }
 0x5dd   :  { %v1645_v52 = vadd.f32 %v3608_v30, %v1644_v33 }
 0x5df   :  { %1656 = vst [vmem:[%s3651_s6 + $0x30] sm:$0xff] %v1645_v52 }
 0x64e   :  { %v1647_v46 = vpop.f32.mrf.mxu0 }
 0x64f   :  { %v1648_v25 = vadd.f32 %v3608_v30, %v1647_v46 }
 0x651   :  { %1657 = vst [vmem:[%s3651_s6 + $0x38] sm:$0xff] %v1648_v25 }

</bundles_post_ra>
